<compile_context>
chip_gen: v7x
topology: tpu7x:2x2x1
jax: 0.10.0
libtpu: 0.0.40
codegen_flags: <defaults>
</compile_context>

<pallas_src>
import functools

import jax
import jax.numpy as jnp
from jax.experimental import pallas as pl
from jax.experimental.pallas import tpu as pltpu


def _round_up(x, m):
    return (x + m - 1) // m * m


def _pick_tm(m_rows):
    """Row tile: sublane-aligned minimal tile for tiny batches; MXU-filling tile
    per TPU generation once there is enough work to amortize grid steps."""
    mr = _round_up(max(m_rows, 1), 8)          # f32/bf16 sublane minimum is 8
    if mr <= 128:
        return mr                              # tiny batch: don't pad to 128 rows
    kind = ""
    try:
        kind = jax.devices()[0].device_kind.lower()
    except Exception:
        pass
    if "v7" in kind and m_rows >= 512:         # >=2 grid steps so both v7x TCs get work
        return 256
    if "v6" in kind and m_rows >= 256:         # fill the v6e 256-row MXU
        return 256
    return 128                                 # v5e MXU rows = 128; 256 only adds pressure


# ----------------------------------------------------------------------------- kernel
def _fused_predictor_kernel(lab_ref, x_ref, w1_ref, w2_ref, w3_ref, b_ref,
                            feats_ref, proxi_ref, onehot_ref,
                            *, n1, n2, n3, fill):
    # Biases: one concatenated (1, n1+n2+n3) f32 row; static lane-aligned slices.
    b1 = b_ref[:, 0:n1]
    b2 = b_ref[:, n1:n1 + n2]
    b3 = b_ref[:, n1 + n2:n1 + n2 + n3]

    # Layer 1: obj_proj1 (1024 -> 256). bf16 MXU operands, f32 accumulate + f32 bias.
    h1 = jnp.dot(x_ref[...].astype(jnp.bfloat16), w1_ref[...],
                 preferred_element_type=jnp.float32) + b1

    # Layer 2: obj_proj_no_lstm (256 -> 512). Cast to bf16 once; reuse the same value
    # for the feats store and the layer-3 LHS (keeps the f32 h2 live range short).
    h2 = jnp.dot(h1.astype(jnp.bfloat16), w2_ref[...],
                 preferred_element_type=jnp.float32) + b2
    h2b = h2.astype(jnp.bfloat16)
    feats_ref[...] = h2b.astype(feats_ref.dtype)

    # Layer 3: obj_proj2 (512 -> 128).
    h3 = jnp.dot(h2b, w3_ref[...], preferred_element_type=jnp.float32) + b3
    proxi_ref[...] = h3.astype(proxi_ref.dtype)

    # to_onehot side output (pure VPU work, free next to the MXU chain).
    lab = lab_ref[...]                                   # (tm, 1) int32
    cols = jax.lax.broadcasted_iota(jnp.int32, onehot_ref.shape, 1)
    oh = jnp.where(lab == cols, jnp.float32(fill), jnp.float32(-fill))
    onehot_ref[...] = oh.astype(onehot_ref.dtype)


def fused_predictor_pallas(labels, x, w1p, w2p, w3p, b_cat, num_obj_cls,
                           *, tm=None, fill=1000.0):
    """Fused obj_proj1 -> obj_proj_no_lstm -> obj_proj2 (+ to_onehot).

    labels:[M] int, x:[M,1024] f32 (cast to bf16 in-kernel),
    w*p:[Kp,Np] bf16 (pre-padded at init), b_cat:[1, N1p+N2p+N3p] f32.
    Returns (obj_feats[M,512] bf16, proxi_obj_feats[M,128] f32,
             onehot[M,Cp] bf16 with Cp = round_up(num_obj_cls, 128)).
    """
    M, K = x.shape
    K1p, N1p = w1p.shape
    N2p = w2p.shape[1]
    N3p = w3p.shape[1]
    Cp = _round_up(num_obj_cls, 128)
    assert K == K1p and w2p.shape[0] == N1p and w3p.shape[0] == N2p
    assert b_cat.shape == (1, N1p + N2p + N3p)

    if tm is None:
        tm = _pick_tm(M)

    # Only per-call data prep: labels as an (M, 1) int32 column (trivial reshape).
    lab = labels.astype(jnp.int32).reshape(M, 1)

    kernel = functools.partial(_fused_predictor_kernel,
                               n1=N1p, n2=N2p, n3=N3p, fill=fill)

    feats, proxi, onehot = pl.pallas_call(
        kernel,
        out_shape=(jax.ShapeDtypeStruct((M, N2p), jnp.bfloat16),
                   jax.ShapeDtypeStruct((M, N3p), jnp.float32),
                   jax.ShapeDtypeStruct((M, Cp), jnp.bfloat16)),
        grid_spec=pltpu.PrefetchScalarGridSpec(
            num_scalar_prefetch=0,
            grid=(pl.cdiv(M, tm),),
            in_specs=[
                pl.BlockSpec((tm, 1), lambda i: (i, 0)),          # labels
                pl.BlockSpec((tm, K1p), lambda i: (i, 0)),        # x (f32; partial last block OK)
                # Weight / bias blocks are grid-invariant (same block every step).
                pl.BlockSpec((K1p, N1p), lambda i: (0, 0)),       # w1
                pl.BlockSpec((N1p, N2p), lambda i: (0, 0)),       # w2 (no_lstm)
                pl.BlockSpec((N2p, N3p), lambda i: (0, 0)),       # w3
                pl.BlockSpec((1, N1p + N2p + N3p), lambda i: (0, 0)),  # concatenated biases
            ],
            out_specs=(
                pl.BlockSpec((tm, N2p), lambda i: (i, 0)),
                pl.BlockSpec((tm, N3p), lambda i: (i, 0)),
                pl.BlockSpec((tm, Cp), lambda i: (i, 0)),
            ),
        ),
        compiler_params=pltpu.CompilerParams(dimension_semantics=("parallel",)),
    )(lab, x, w1p, w2p, w3p, b_cat)

    # Class axis of onehot stays padded to Cp; slice lazily downstream if needed.
    return feats, proxi, onehot


# ------------------------------------------------------------------------- parameters
def _xavier_linear(key, fan_in, fan_out):
    # matches layer_init(..., xavier=True): xavier-uniform weight, zero bias.
    bound = jnp.sqrt(6.0 / (fan_in + fan_out))
    w = jax.random.uniform(key, (fan_in, fan_out), jnp.float32, -bound, bound)
    b = jnp.zeros((fan_out,), jnp.float32)
    return w, b


def _pad_weight_for_kernel(w):
    """Pad to (Kp, Np) with Kp, Np multiples of 128; bf16 weights."""
    K, N = w.shape
    Kp, Np = _round_up(K, 128), _round_up(N, 128)
    return jnp.zeros((Kp, Np), jnp.bfloat16).at[:K, :N].set(w.astype(jnp.bfloat16))


def _pad_bias(b, n_pad):
    return jnp.zeros((n_pad,), jnp.float32).at[:b.shape[0]].set(b.astype(jnp.float32))


class PretrainPredictorPallas:
    """Pallas re-implementation of PretrainPredictor's tensor hot path (predcls mode)."""

    def __init__(self, num_obj_cls=160, *, key=None, tm=None):
        if key is None:
            key = jax.random.PRNGKey(0)
        self.num_obj_cls = num_obj_cls
        self.tm = tm   # None -> auto-pick per call (per-generation / per-batch-size)
        k1, k2, k3, k4 = jax.random.split(key, 4)
        self.w_proj1, self.b_proj1 = _xavier_linear(k1, 1024, 256)        # obj_proj1
        self.w_proj2, self.b_proj2 = _xavier_linear(k2, 512, 128)         # obj_proj2
        self.w_compress, self.b_compress = _xavier_linear(k3, 456, num_obj_cls)  # obj_compress (unused in forward, as in reference)
        self.w_no_lstm, self.b_no_lstm = _xavier_linear(k4, 256, 512)     # obj_proj_no_lstm

        # One-time pad + bf16 cast of the kernel-side weights (no per-forward copies).
        self._w1p = _pad_weight_for_kernel(self.w_proj1)
        self._w2p = _pad_weight_for_kernel(self.w_no_lstm)
        self._w3p = _pad_weight_for_kernel(self.w_proj2)
        n1p, n2p, n3p = self._w1p.shape[1], self._w2p.shape[1], self._w3p.shape[1]
        # Single concatenated f32 bias row (one grid-invariant input instead of three).
        self._bcat = jnp.concatenate(
            [_pad_bias(self.b_proj1, n1p),
             _pad_bias(self.b_no_lstm, n2p),
             _pad_bias(self.b_proj2, n3p)], axis=0).reshape(1, n1p + n2p + n3p)

    @staticmethod
    def _split(x, num_real_objs):
        out, off = [], 0
        for n in num_real_objs:
            out.append(x[off:off + n])
            off += n
        return out

    @staticmethod
    def _get_floor_idx(labels):
        # first index where label == 1, else 0 ("NO FLOOR" fallback)
        has_floor = jnp.any(labels == 1)
        return jnp.where(has_floor, jnp.argmax(labels == 1), 0)

    def forward(self, obj_features, labels_per_proposal, obj_ids_per_proposal):
        num_real_objs = [int(l.shape[0]) for l in labels_per_proposal]
        obj_id_this_batch = jnp.concatenate(obj_ids_per_proposal, axis=0)
        all_labels = jnp.concatenate(labels_per_proposal, axis=0)

        # TODO(synk): LSTMContext (context_layer1) is an external, undefined sub-module;
        # using the module's own `obj_proj_no_lstm` (no_lstm ablation) projection path.
        obj_feats, proxi_obj_feats, onehot_padded = fused_predictor_pallas(
            all_labels, obj_features,
            self._w1p, self._w2p, self._w3p, self._bcat,
            self.num_obj_cls, tm=self.tm)

        obj_feats_split = self._split(obj_feats, num_real_objs)
        proxi_obj_feats_split = self._split(proxi_obj_feats, num_real_objs)
        # predcls mode -> obj_dists = to_onehot(labels, num_obj_cls) per proposal.
        # (Single class-axis slice; keep the axis padded end-to-end if downstream allows.)
        obj_dists = self._split(onehot_padded[:, :self.num_obj_cls], num_real_objs)

        floor_idx = [self._get_floor_idx(l) for l in labels_per_proposal]

        # TODO(synk): support_detector / proximity_detector / assemble_support_pairs /
        # assemble_eval_labels are external samplers + data-dependent Python loops with
        # no defined tensor semantics in the reference — not translated.

        return (obj_dists, obj_feats_split, proxi_obj_feats_split,
                floor_idx, obj_id_this_batch)


# ------------------------------------------------------------------------------ main
if __name__ == "__main__":
    key = jax.random.PRNGKey(0)
    k_feat, k_lab0, k_lab1, k_param = jax.random.split(key, 4)

    NUM_OBJ_CLS = 160                      # 3RScan object-class count
    num_real_objs = [5, 7]                 # two proposals in the batch
    N = sum(num_real_objs)

    obj_features = jax.random.normal(k_feat, (N, 1024), jnp.float32)
    labels0 = jax.random.randint(k_lab0, (num_real_objs[0],), 2, NUM_OBJ_CLS, jnp.int32)
    labels0 = labels0.at[2].set(1)         # plant a "floor" label in proposal 0
    labels1 = jax.random.randint(k_lab1, (num_real_objs[1],), 2, NUM_OBJ_CLS, jnp.int32)
    obj_ids0 = jnp.arange(num_real_objs[0], dtype=jnp.int32)
    obj_ids1 = jnp.arange(num_real_objs[1], dtype=jnp.int32) + 100

    model = PretrainPredictorPallas(NUM_OBJ_CLS, key=k_param)
    out = model.forward(obj_features, [labels0, labels1], [obj_ids0, obj_ids1])
    out = jax.block_until_ready(out)
    obj_dists, obj_feats_split, proxi_split, floor_idx, obj_ids = out

    # quiet correctness checks against plain-JAX references using the same
    # bf16-operand / f32-accumulate matmul path as the kernel
    xb = obj_features.astype(jnp.bfloat16)
    ref1 = jnp.dot(xb, model.w_proj1.astype(jnp.bfloat16),
                   preferred_element_type=jnp.float32) + model.b_proj1
    ref2 = jnp.dot(ref1.astype(jnp.bfloat16), model.w_no_lstm.astype(jnp.bfloat16),
                   preferred_element_type=jnp.float32) + model.b_no_lstm
    ref3 = jnp.dot(ref2.astype(jnp.bfloat16), model.w_proj2.astype(jnp.bfloat16),
                   preferred_element_type=jnp.float32) + model.b_proj2
    got_feats = jnp.concatenate(obj_feats_split, axis=0).astype(jnp.float32)
    got_proxi = jnp.concatenate(proxi_split, axis=0)
    assert jnp.allclose(got_feats, ref2, atol=3e-2, rtol=3e-2)
    assert jnp.allclose(got_proxi, ref3, atol=3e-2, rtol=3e-2)
    ref_oh = jnp.where(
        labels0[:, None] == jnp.arange(NUM_OBJ_CLS)[None, :], 1000.0, -1000.0)
    assert jnp.allclose(obj_dists[0].astype(jnp.float32), ref_oh)
    assert int(floor_idx[0]) == 2 and int(floor_idx[1]) == 0
    assert obj_ids.shape == (N,)

    print("KERNEL_OK")
</pallas_src>

<mosaic_0001>
module attributes {stable_mosaic.version = 11 : i64} {
  func.func @_fused_predictor_kernel(%arg0: i32, %arg1: memref<16x1xi32, #tpu.memory_space<vmem>>, %arg2: memref<16x1024xf32, #tpu.memory_space<vmem>>, %arg3: memref<1024x256xbf16, #tpu.memory_space<vmem>>, %arg4: memref<256x512xbf16, #tpu.memory_space<vmem>>, %arg5: memref<512x128xbf16, #tpu.memory_space<vmem>>, %arg6: memref<1x896xf32, #tpu.memory_space<vmem>>, %arg7: memref<16x512xbf16, #tpu.memory_space<vmem>>, %arg8: memref<16x128xf32, #tpu.memory_space<vmem>>, %arg9: memref<16x256xbf16, #tpu.memory_space<vmem>>) attributes {dimension_semantics = [#tpu.dimension_semantics<parallel>], iteration_bounds = array<i64: 1>, scalar_prefetch = 0 : i64, scratch_operands = 0 : i64, tpu.core_type = #tpu.core_type<tc>, window_params = [{transform_indices = @transform_0, window_bounds = array<i64: 16, 1>}, {transform_indices = @transform_1, window_bounds = array<i64: 16, 1024>}, {pipeline_mode = #tpu.pipeline_mode<synchronous>, transform_indices = @transform_2, window_bounds = array<i64: 1024, 256>}, {pipeline_mode = #tpu.pipeline_mode<synchronous>, transform_indices = @transform_3, window_bounds = array<i64: 256, 512>}, {pipeline_mode = #tpu.pipeline_mode<synchronous>, transform_indices = @transform_4, window_bounds = array<i64: 512, 128>}, {pipeline_mode = #tpu.pipeline_mode<synchronous>, transform_indices = @transform_5, window_bounds = array<i64: 1, 896>}, {transform_indices = @transform_6, window_bounds = array<i64: 16, 512>}, {transform_indices = @transform_7, window_bounds = array<i64: 16, 128>}, {transform_indices = @transform_8, window_bounds = array<i64: 16, 256>}]} {
    %c0 = arith.constant 0 : index
    %c0_0 = arith.constant 0 : index
    %0 = vector.load %arg6[%c0, %c0_0] : memref<1x896xf32, #tpu.memory_space<vmem>>, vector<1x256xf32>
    %c0_1 = arith.constant 0 : index
    %c256 = arith.constant 256 : index
    %1 = vector.load %arg6[%c0_1, %c256] : memref<1x896xf32, #tpu.memory_space<vmem>>, vector<1x512xf32>
    %c0_2 = arith.constant 0 : index
    %c768 = arith.constant 768 : index
    %2 = vector.load %arg6[%c0_2, %c768] : memref<1x896xf32, #tpu.memory_space<vmem>>, vector<1x128xf32>
    %c0_3 = arith.constant 0 : index
    %c0_4 = arith.constant 0 : index
    %3 = vector.load %arg2[%c0_3, %c0_4] : memref<16x1024xf32, #tpu.memory_space<vmem>>, vector<16x1024xf32>
    %4 = arith.truncf %3 : vector<16x1024xf32> to vector<16x1024xbf16>
    %c0_5 = arith.constant 0 : index
    %c0_6 = arith.constant 0 : index
    %5 = vector.load %arg3[%c0_5, %c0_6] : memref<1024x256xbf16, #tpu.memory_space<vmem>>, vector<1024x256xbf16>
    %cst = arith.constant dense<0.000000e+00> : vector<16x256xf32>
    %6 = tpu.matmul %4, %5, %cst {dimension_numbers = #tpu.dot_dimension_numbers<[1], [0], [0], [1], [0, 0, 1, 1], [], []>} : vector<16x1024xbf16>, vector<1024x256xbf16>, vector<16x256xf32> -> vector<16x256xf32>
    %7 = vector.broadcast %0 : vector<1x256xf32> to vector<16x256xf32>
    %8 = arith.addf %6, %7 : vector<16x256xf32>
    %9 = arith.truncf %8 : vector<16x256xf32> to vector<16x256xbf16>
    %c0_7 = arith.constant 0 : index
    %c0_8 = arith.constant 0 : index
    %10 = vector.load %arg4[%c0_7, %c0_8] : memref<256x512xbf16, #tpu.memory_space<vmem>>, vector<256x512xbf16>
    %cst_9 = arith.constant dense<0.000000e+00> : vector<16x512xf32>
    %11 = tpu.matmul %9, %10, %cst_9 {dimension_numbers = #tpu.dot_dimension_numbers<[1], [0], [0], [1], [0, 0, 1, 1], [], []>} : vector<16x256xbf16>, vector<256x512xbf16>, vector<16x512xf32> -> vector<16x512xf32>
    %12 = vector.broadcast %1 : vector<1x512xf32> to vector<16x512xf32>
    %13 = arith.addf %11, %12 : vector<16x512xf32>
    %14 = arith.truncf %13 : vector<16x512xf32> to vector<16x512xbf16>
    %c0_10 = arith.constant 0 : index
    %c0_11 = arith.constant 0 : index
    %15 = vector.load %arg7[%c0_10, %c0_11] : memref<16x512xbf16, #tpu.memory_space<vmem>>, vector<16x512xbf16>
    tpu.vector_store %arg7[%c0_10, %c0_11], %14 {strides = array<i32>} : memref<16x512xbf16, #tpu.memory_space<vmem>>, vector<16x512xbf16>,
    %c0_12 = arith.constant 0 : index
    %c0_13 = arith.constant 0 : index
    %16 = vector.load %arg5[%c0_12, %c0_13] : memref<512x128xbf16, #tpu.memory_space<vmem>>, vector<512x128xbf16>
    %cst_14 = arith.constant dense<0.000000e+00> : vector<16x128xf32>
    %17 = tpu.matmul %14, %16, %cst_14 {dimension_numbers = #tpu.dot_dimension_numbers<[1], [0], [0], [1], [0, 0, 1, 1], [], []>} : vector<16x512xbf16>, vector<512x128xbf16>, vector<16x128xf32> -> vector<16x128xf32>
    %18 = vector.broadcast %2 : vector<1x128xf32> to vector<16x128xf32>
    %19 = arith.addf %17, %18 : vector<16x128xf32>
    %c0_15 = arith.constant 0 : index
    %c0_16 = arith.constant 0 : index
    %20 = vector.load %arg8[%c0_15, %c0_16] : memref<16x128xf32, #tpu.memory_space<vmem>>, vector<16x128xf32>
    tpu.vector_store %arg8[%c0_15, %c0_16], %19 {strides = array<i32>} : memref<16x128xf32, #tpu.memory_space<vmem>>, vector<16x128xf32>,
    %c0_17 = arith.constant 0 : index
    %c0_18 = arith.constant 0 : index
    %21 = vector.load %arg1[%c0_17, %c0_18] : memref<16x1xi32, #tpu.memory_space<vmem>>, vector<16x1xi32>
    %22 = tpu.iota {dimensions = array<i32: 1>} : vector<16x256xi32>
    %23 = vector.broadcast %21 : vector<16x1xi32> to vector<16x256xi32>
    %24 = arith.cmpi eq, %23, %22 : vector<16x256xi32>
    %cst_19 = arith.constant 1.000000e+03 : f32
    %cst_20 = arith.constant -1.000000e+03 : f32
    %25 = vector.broadcast %cst_19 : f32 to vector<16x256xf32>
    %26 = vector.broadcast %cst_20 : f32 to vector<16x256xf32>
    %27 = arith.select %24, %25, %26 : vector<16x256xi1>, vector<16x256xf32>
    %28 = arith.truncf %27 : vector<16x256xf32> to vector<16x256xbf16>
    %c0_21 = arith.constant 0 : index
    %c0_22 = arith.constant 0 : index
    %29 = vector.load %arg9[%c0_21, %c0_22] : memref<16x256xbf16, #tpu.memory_space<vmem>>, vector<16x256xbf16>
    tpu.vector_store %arg9[%c0_21, %c0_22], %28 {strides = array<i32>} : memref<16x256xbf16, #tpu.memory_space<vmem>>, vector<16x256xbf16>,
    return
  }
  func.func @transform_0(%arg0: i32) -> (i32, i32) {
    %c0_i32 = arith.constant 0 : i32
    %c0_i32_0 = arith.constant 0 : i32
    return %arg0, %c0_i32 : i32, i32
  }
  func.func @transform_1(%arg0: i32) -> (i32, i32) {
    %c0_i32 = arith.constant 0 : i32
    %c0_i32_0 = arith.constant 0 : i32
    return %arg0, %c0_i32 : i32, i32
  }
  func.func @transform_2(%arg0: i32) -> (i32, i32) {
    %c0_i32 = arith.constant 0 : i32
    %c0_i32_0 = arith.constant 0 : i32
    %c0_i32_1 = arith.constant 0 : i32
    return %c0_i32, %c0_i32_0 : i32, i32
  }
  func.func @transform_3(%arg0: i32) -> (i32, i32) {
    %c0_i32 = arith.constant 0 : i32
    %c0_i32_0 = arith.constant 0 : i32
    %c0_i32_1 = arith.constant 0 : i32
    return %c0_i32, %c0_i32_0 : i32, i32
  }
  func.func @transform_4(%arg0: i32) -> (i32, i32) {
    %c0_i32 = arith.constant 0 : i32
    %c0_i32_0 = arith.constant 0 : i32
    %c0_i32_1 = arith.constant 0 : i32
    return %c0_i32, %c0_i32_0 : i32, i32
  }
  func.func @transform_5(%arg0: i32) -> (i32, i32) {
    %c0_i32 = arith.constant 0 : i32
    %c0_i32_0 = arith.constant 0 : i32
    %c0_i32_1 = arith.constant 0 : i32
    return %c0_i32, %c0_i32_0 : i32, i32
  }
  func.func @transform_6(%arg0: i32) -> (i32, i32) {
    %c0_i32 = arith.constant 0 : i32
    %c0_i32_0 = arith.constant 0 : i32
    return %arg0, %c0_i32 : i32, i32
  }
  func.func @transform_7(%arg0: i32) -> (i32, i32) {
    %c0_i32 = arith.constant 0 : i32
    %c0_i32_0 = arith.constant 0 : i32
    return %arg0, %c0_i32 : i32, i32
  }
  func.func @transform_8(%arg0: i32) -> (i32, i32) {
    %c0_i32 = arith.constant 0 : i32
    %c0_i32_0 = arith.constant 0 : i32
    return %arg0, %c0_i32 : i32, i32
  }
}

</mosaic_0001>

<bundles_post_ra>
// kernel: tpu_custom_call.1
= control target key start
LH: loop header
LB: loop body
LE: loop exit
PB: predicated region body
PF: predicated region fallthrough
CT: control target
= control target key end

     0   :  { %14 = vsyncpa [#allocation3], 0  ;;  %s3015_s0 = inlined_call_operand.vmem [shape: s32[12,1], index: 0, kind: input, shape index: {}]   ;;  %s3016_s1 = inlined_call_operand.hbm [shape: f32[12,1024], index: 1, kind: input, shape index: {}]   ;;  %s3017_s2 = inlined_call_operand.hbm [shape: bf16[1024,256], index: 2, kind: input, shape index: {}]   ;;  %s3018_s3 = inlined_call_operand.hbm [shape: bf16[256,512], index: 3, kind: input, shape index: {}]   ;;  %s3019_s4 = inlined_call_operand.hbm [shape: bf16[512,128], index: 4, kind: input, shape index: {}]   ;;  %s3020_s5 = inlined_call_operand.vmem [shape: f32[1,896], index: 5, kind: input, shape index: {}]   ;;  %s3021_s6 = inlined_call_operand.hbm [shape: bf16[12,512], index: 6, kind: output, shape index: {0}]   ;;  %s3022_s7 = inlined_call_operand.hbm [shape: f32[12,128], index: 7, kind: output, shape index: {1}]   ;;  %s3023_s8 = inlined_call_operand.hbm [shape: bf16[12,256], index: 8, kind: output, shape index: {2}]  }
   0x1   :  { %15 = vsyncpa [#allocation6], 0 }
   0x2   :  { %16 = vsyncpa [#allocation9], 0 }
   0x3   :  { %17 = vsyncpa [#allocation4], 0 }
   0x4   :  { %18 = vsyncpa [#allocation12], 0  ;;  %s2810_s27 = smov [#allocation5]   ;;  %s2646_s9 = scalar_lea.hbm %s3017_s2, 16384 }
   0x5   :  { %s38_s28 = sshll.u32 %s2810_s27, 4  ;;  %p2647_p0 = scmp.ne.s32.totalorder %s3017_s2, %s2646_s9  ;;  %s39_s28 = int_to_ptr.vmem [resolvable:$true] %s38_s28 }
   0x6   :  { %p2650_p1 = scmp.lt.u32.totalorder %s2646_s9, %s3017_s2 }
   0x8   :  { %p2652_p2 = pnand %p2650_p1, %p2647_p0 }
   0xa   :  { %2655 = shalt.err (!%p2652_p2)
}
   0xb   :  { %s2656_s14 = scalar_lea.vmem %s39_s28, 16384  ;;  %p2661_p4 = scmp.lt.s32.totalorder %s39_s28, %s39_s28 }
   0xc   :  { %p2657_p3 = scmp.ne.s32.totalorder %s39_s28, %s2656_s14  ;;  %p2662_p5 = scmp.lt.s32.totalorder %s2656_s14, %s2656_s14 }
   0xe   :  { %p2663_p6 = por %p2662_p5, %p2661_p4 }
  0x10   :  { %p2664_p7 = pnand %p2663_p6, %p2657_p3 }
  0x12   :  { %2667 = shalt.err (!%p2664_p7)
}
  0x13   :  { %s2811_s15 = smov 128   ;;  %s2812_s16 = smov 8  }
  0x14   :  { %44 = dma.hbm_to_vmem [thread:$0]  %s3017_s2, 16384, %s39_s28, [#allocation6], %s2811_s15, %s2811_s15, %s2812_s16  }
  0x15   :  { %s2813_s19 = smov [#allocation2]   ;;  %s2668_s23 = scalar_lea.hbm %s3016_s1, 2048 }
  0x16   :  { %s26_s20 = sshll.u32 %s2813_s19, 4  ;;  %p2669_p8 = scmp.ne.s32.totalorder %s3016_s1, %s2668_s23  ;;  %s27_s20 = int_to_ptr.vmem [resolvable:$true] %s26_s20 }
  0x17   :  { %p2672_p9 = scmp.lt.u32.totalorder %s2668_s23, %s3016_s1 }
  0x19   :  { %p2674_p10 = pnand %p2672_p9, %p2669_p8 }
  0x1b   :  { %2677 = shalt.err (!%p2674_p10)
}
  0x1c   :  { %s2678_s29 = scalar_lea.vmem %s27_s20, 2048  ;;  %p2683_p12 = scmp.lt.s32.totalorder %s27_s20, %s27_s20 }
  0x1d   :  { %p2679_p11 = scmp.ne.s32.totalorder %s27_s20, %s2678_s29  ;;  %p2684_p13 = scmp.lt.s32.totalorder %s2678_s29, %s2678_s29 }
  0x1f   :  { %p2685_p0 = por %p2684_p13, %p2683_p12 }
  0x21   :  { %p2686_p1 = pnand %p2685_p0, %p2679_p11 }
  0x23   :  { %2689 = shalt.err (!%p2686_p1)
}
  0x24   :  { %s2814_s2 = smov 1024   ;;  %s2815_s28 = smov 64  }
  0x25   :  { %32 = dma.hbm_to_vmem [thread:$0]  %s3016_s1, 2048, %s27_s20, [#allocation3], %s2814_s2, %s2814_s2, %s2815_s28  }
  0x26   :  { %s2816_s10 = smov [#allocation7]   ;;  %s2690_s14 = scalar_lea.hbm %s3018_s3, 8192 }
  0x27   :  { %s50_s11 = sshll.u32 %s2816_s10, 4  ;;  %p2691_p2 = scmp.ne.s32.totalorder %s3018_s3, %s2690_s14  ;;  %s51_s11 = int_to_ptr.vmem [resolvable:$true] %s50_s11 }
  0x28   :  { %p2694_p3 = scmp.lt.u32.totalorder %s2690_s14, %s3018_s3 }
  0x2a   :  { %p2696_p4 = pnand %p2694_p3, %p2691_p2 }
  0x2c   :  { %2699 = shalt.err (!%p2696_p4)
}
  0x2d   :  { %s2700_s22 = scalar_lea.vmem %s51_s11, 8192  ;;  %p2705_p6 = scmp.lt.s32.totalorder %s51_s11, %s51_s11 }
  0x2e   :  { %p2701_p5 = scmp.ne.s32.totalorder %s51_s11, %s2700_s22  ;;  %p2706_p7 = scmp.lt.s32.totalorder %s2700_s22, %s2700_s22 }
  0x30   :  { %p2707_p8 = por %p2706_p7, %p2705_p6 }
  0x32   :  { %p2708_p9 = pnand %p2707_p8, %p2701_p5 }
  0x34   :  { %2711 = shalt.err (!%p2708_p9)
}
  0x35   :  { %s2817_s1 = smov 256   ;;  %s2818_s20 = smov 16  }
  0x36   :  { %56 = dma.hbm_to_vmem [thread:$0]  %s3018_s3, 8192, %s51_s11, [#allocation6], %s2817_s1, %s2817_s1, %s2818_s20  }
  0x37   :  { %s2819_s25 = smov [#allocation8]   ;;  %s2712_s2 = scalar_lea.hbm %s3019_s4, 4096 }
  0x38   :  { %s62_s26 = sshll.u32 %s2819_s25, 4  ;;  %p2713_p10 = scmp.ne.s32.totalorder %s3019_s4, %s2712_s2  ;;  %s63_s26 = int_to_ptr.vmem [resolvable:$true] %s62_s26 }
  0x39   :  { %p2716_p11 = scmp.lt.u32.totalorder %s2712_s2, %s3019_s4 }
  0x3b   :  { %p2718_p12 = pnand %p2716_p11, %p2713_p10 }
  0x3d   :  { %2721 = shalt.err (!%p2718_p12)
}
  0x3e   :  { %s2722_s13 = scalar_lea.vmem %s63_s26, 4096  ;;  %p2727_p0 = scmp.lt.s32.totalorder %s63_s26, %s63_s26 }
  0x3f   :  { %p2723_p13 = scmp.ne.s32.totalorder %s63_s26, %s2722_s13  ;;  %p2728_p1 = scmp.lt.s32.totalorder %s2722_s13, %s2722_s13 }
  0x41   :  { %p2729_p2 = por %p2728_p1, %p2727_p0 }
  0x43   :  { %p2730_p3 = pnand %p2729_p2, %p2723_p13 }
  0x45   :  { %2733 = shalt.err (!%p2730_p3)
}
  0x46   :  { %s2820_s3 = smov 4  }
  0x47   :  { %68 = dma.hbm_to_vmem [thread:$0]  %s3019_s4, 4096, %s63_s26, [#allocation9], %s2815_s28, %s2815_s28, %s2820_s3  }
  0x48   :  { %2800 = dma.done.wait [#allocation3], 2048  }
  0x49   :  { %2801 = vsyncadd [#allocation3], 4294965248 }
  0x4a   :  { %2802 = dma.done.wait [#allocation6], 24576  }
  0x4b   :  { %2803 = vsyncadd [#allocation6], 4294942720 }
  0x4c   :  { %2804 = dma.done.wait [#allocation9], 4096  }
  0x4d   :  { %2805 = vsyncadd [#allocation9], 4294963200  ;;  %v2326_v0 = vld [vmem:[#allocation5 + $0x4] ss:$8 sps:$4 sm:$0xff]   ;;  %v2328_v1 = vld [vmem:[#allocation5] ss:$8 sps:$4 sm:$0xff]  }
  0x4e   :  { %890 = vmatprep.subr.bf16.mxu0 %v2326_v0  ;;  %v2329_v2 = vld [vmem:[#allocation5 + $0x14] ss:$8 sps:$4 sm:$0xff]   ;;  %v2331_v3 = vld [vmem:[#allocation5 + $0x10] ss:$8 sps:$4 sm:$0xff]   ;;  %v2332_v4 = vld [vmem:[#allocation5 + $0x24] ss:$8 sps:$4 sm:$0xff]  }
  0x4f   :  { %891 = vmatpush1.bf16.msra.mxu0 %v2328_v1  ;;  %v2334_v5 = vld [vmem:[#allocation5 + $0x20] ss:$8 sps:$4 sm:$0xff]   ;;  %v2335_v6 = vld [vmem:[#allocation5 + $0x34] ss:$8 sps:$4 sm:$0xff]   ;;  %v2337_v7 = vld [vmem:[#allocation5 + $0x30] ss:$8 sps:$4 sm:$0xff]  }
  0x50   :  { %892 = vmatprep.subr.bf16.mxu0 %v2329_v2  ;;  %v2338_v8 = vld [vmem:[#allocation5 + $0x44] ss:$8 sps:$4 sm:$0xff]   ;;  %v2340_v9 = vld [vmem:[#allocation5 + $0x40] ss:$8 sps:$4 sm:$0xff]   ;;  %v2341_v10 = vld [vmem:[#allocation5 + $0x54] ss:$8 sps:$4 sm:$0xff]  }
  0x51   :  { %v2343_v11 = vld [vmem:[#allocation5 + $0x50] ss:$8 sps:$4 sm:$0xff]   ;;  %v2344_v12 = vld [vmem:[#allocation5 + $0x64] ss:$8 sps:$4 sm:$0xff]   ;;  %v2346_v16 = vld [vmem:[#allocation5 + $0x60] ss:$8 sps:$4 sm:$0xff]  }
  0x52   :  { %v88_v13 = vld [vmem:[#allocation2 + $0x8] sm:$0xff]  ;;  %v2347_v17 = vld [vmem:[#allocation5 + $0x74] ss:$8 sps:$4 sm:$0xff]   ;;  %v2349_v18 = vld [vmem:[#allocation5 + $0x70] ss:$8 sps:$4 sm:$0xff]  }
  0x53   :  { %893 = vmatpush1.bf16.msra.mxu0 %v2331_v3  ;;  %v96_v14 = vld [vmem:[#allocation2 + $0x48] sm:$0xff]  ;;  %v2353_v21 = vld [vmem:[#allocation5 + $0x94] ss:$8 sps:$4 sm:$0xff]   ;;  %v2355_v22 = vld [vmem:[#allocation5 + $0x90] ss:$8 sps:$4 sm:$0xff]  }
  0x54   :  { %894 = vmatprep.subr.bf16.mxu0 %v2332_v4  ;;  %v104_v15 = vpack.c.bf16 %v96_v14, %v88_v13  ;;  %v2350_v19 = vld [vmem:[#allocation5 + $0x84] ss:$8 sps:$4 sm:$0xff]   ;;  %v2352_v20 = vld [vmem:[#allocation5 + $0x80] ss:$8 sps:$4 sm:$0xff]   ;;  %v2359_v25 = vld [vmem:[#allocation5 + $0xb4] ss:$8 sps:$4 sm:$0xff]  }
  0x55   :  { %v2356_v23 = vld [vmem:[#allocation5 + $0xa4] ss:$8 sps:$4 sm:$0xff]   ;;  %v2358_v24 = vld [vmem:[#allocation5 + $0xa0] ss:$8 sps:$4 sm:$0xff]   ;;  %v2361_v26 = vld [vmem:[#allocation5 + $0xb0] ss:$8 sps:$4 sm:$0xff]  }
  0x56   :  { %922 = vmatprep.mubr.bf16.mxu0 %v104_v15  ;;  %v2362_v27 = vld [vmem:[#allocation5 + $0xc4] ss:$8 sps:$4 sm:$0xff]   ;;  %v2364_v28 = vld [vmem:[#allocation5 + $0xc0] ss:$8 sps:$4 sm:$0xff]   ;;  %v2365_v29 = vld [vmem:[#allocation5 + $0xd4] ss:$8 sps:$4 sm:$0xff]  }
  0x57   :  { %895 = vmatpush1.bf16.msra.mxu0 %v2334_v5  ;;  %v2367_v30 = vld [vmem:[#allocation5 + $0xd0] ss:$8 sps:$4 sm:$0xff]   ;;  %v2368_v31 = vld [vmem:[#allocation5 + $0xe4] ss:$8 sps:$4 sm:$0xff]   ;;  %v2370_v32 = vld [vmem:[#allocation5 + $0xe0] ss:$8 sps:$4 sm:$0xff]  }
  0x58   :  { %896 = vmatprep.subr.bf16.mxu0 %v2335_v6  ;;  %v2371_v33 = vld [vmem:[#allocation5 + $0xf4] ss:$8 sps:$4 sm:$0xff]   ;;  %v2373_v34 = vld [vmem:[#allocation5 + $0xf0] ss:$8 sps:$4 sm:$0xff]   ;;  %v2376_v35 = vld [vmem:[#allocation5 + $0x104] ss:$8 sps:$4 sm:$0xff]  }
  0x59   :  { %v87_v36 = vld [vmem:[#allocation2] sm:$0xff]  ;;  %v90_v38 = vld [vmem:[#allocation2 + $0x18] sm:$0xff]  ;;  %v100_v13 = vld [vmem:[#allocation2 + $0x68] sm:$0xff] }
  0x5a   :  { %v95_v37 = vld [vmem:[#allocation2 + $0x40] sm:$0xff]  ;;  %v98_v39 = vld [vmem:[#allocation2 + $0x58] sm:$0xff] }
  0x5b   :  { %897 = vmatpush1.bf16.msra.mxu0 %v2337_v7  ;;  %v103_v40 = vpack.c.bf16 %v95_v37, %v87_v36  ;;  %v2374_v41 = vld [vmem:[#allocation5 + $0x100] ss:$8 sps:$4 sm:$0xff]   ;;  %v106_v42 = vpack.c.bf16 %v98_v39, %v90_v38  ;;  %v2379_v43 = vld [vmem:[#allocation5 + $0x114] ss:$8 sps:$4 sm:$0xff]   ;;  %v2377_v44 = vld [vmem:[#allocation5 + $0x110] ss:$8 sps:$4 sm:$0xff]  }
  0x5c   :  { %898 = vmatprep.subr.bf16.mxu0 %v2338_v8  ;;  %v2382_v45 = vld [vmem:[#allocation5 + $0x124] ss:$8 sps:$4 sm:$0xff]   ;;  %v2380_v46 = vld [vmem:[#allocation5 + $0x120] ss:$8 sps:$4 sm:$0xff]   ;;  %v2385_v47 = vld [vmem:[#allocation5 + $0x134] ss:$8 sps:$4 sm:$0xff]  }
  0x5d   :  { %v2383_v48 = vld [vmem:[#allocation5 + $0x130] ss:$8 sps:$4 sm:$0xff]   ;;  %v2388_v49 = vld [vmem:[#allocation5 + $0x144] ss:$8 sps:$4 sm:$0xff]   ;;  %v2386_v50 = vld [vmem:[#allocation5 + $0x140] ss:$8 sps:$4 sm:$0xff]  }
  0x5e   :  { %v2391_v51 = vld [vmem:[#allocation5 + $0x154] ss:$8 sps:$4 sm:$0xff]   ;;  %v2389_v52 = vld [vmem:[#allocation5 + $0x150] ss:$8 sps:$4 sm:$0xff]   ;;  %v2394_v53 = vld [vmem:[#allocation5 + $0x164] ss:$8 sps:$4 sm:$0xff]  }
  0x5f   :  { %899 = vmatpush1.bf16.msra.mxu0 %v2340_v9  ;;  %v2392_v54 = vld [vmem:[#allocation5 + $0x160] ss:$8 sps:$4 sm:$0xff]   ;;  %v2397_v55 = vld [vmem:[#allocation5 + $0x174] ss:$8 sps:$4 sm:$0xff]   ;;  %v2395_v56 = vld [vmem:[#allocation5 + $0x170] ss:$8 sps:$4 sm:$0xff]  }
  0x60   :  { %900 = vmatprep.subr.bf16.mxu0 %v2341_v10  ;;  %v2400_v57 = vld [vmem:[#allocation5 + $0x184] ss:$8 sps:$4 sm:$0xff]   ;;  %v2398_v58 = vld [vmem:[#allocation5 + $0x180] ss:$8 sps:$4 sm:$0xff]   ;;  %v2403_v59 = vld [vmem:[#allocation5 + $0x194] ss:$8 sps:$4 sm:$0xff]  }
  0x61   :  { %v2401_v60 = vld [vmem:[#allocation5 + $0x190] ss:$8 sps:$4 sm:$0xff]   ;;  %v2406_v61 = vld [vmem:[#allocation5 + $0x1a4] ss:$8 sps:$4 sm:$0xff]   ;;  %v2404_v62 = vld [vmem:[#allocation5 + $0x1a0] ss:$8 sps:$4 sm:$0xff]  }
  0x62   :  { %v2409_v63 = vld [vmem:[#allocation5 + $0x1b4] ss:$8 sps:$4 sm:$0xff]   ;;  %v2407_v0 = vld [vmem:[#allocation5 + $0x1b0] ss:$8 sps:$4 sm:$0xff]   ;;  %v2412_v1 = vld [vmem:[#allocation5 + $0x1c4] ss:$8 sps:$4 sm:$0xff]  }
  0x63   :  { %901 = vmatpush1.bf16.msra.mxu0 %v2343_v11  ;;  %v2410_v2 = vld [vmem:[#allocation5 + $0x1c0] ss:$8 sps:$4 sm:$0xff]   ;;  %v2415_v3 = vld [vmem:[#allocation5 + $0x1d4] ss:$8 sps:$4 sm:$0xff]   ;;  %v2413_v4 = vld [vmem:[#allocation5 + $0x1d0] ss:$8 sps:$4 sm:$0xff]  }
  0x64   :  { %902 = vmatprep.subr.bf16.mxu0 %v2344_v12  ;;  %v2418_v5 = vld [vmem:[#allocation5 + $0x1e4] ss:$8 sps:$4 sm:$0xff]   ;;  %v2416_v6 = vld [vmem:[#allocation5 + $0x1e0] ss:$8 sps:$4 sm:$0xff]   ;;  %v2421_v7 = vld [vmem:[#allocation5 + $0x1f4] ss:$8 sps:$4 sm:$0xff]  }
  0x65   :  { %v2419_v8 = vld [vmem:[#allocation5 + $0x1f0] ss:$8 sps:$4 sm:$0xff]   ;;  %v2424_v11 = vld [vmem:[#allocation5 + $0x204] ss:$8 sps:$4 sm:$0xff]   ;;  %v2422_v15 = vld [vmem:[#allocation5 + $0x200] ss:$8 sps:$4 sm:$0xff]  }
  0x66   :  { %v89_v9 = vld [vmem:[#allocation2 + $0x10] sm:$0xff]  ;;  %v92_v12 = vld [vmem:[#allocation2 + $0x28] sm:$0xff] }
  0x67   :  { %903 = vmatpush1.bf16.msra.mxu0 %v2346_v16  ;;  %v97_v10 = vld [vmem:[#allocation2 + $0x50] sm:$0xff]  ;;  %v2442_v38 = vld [vmem:[#allocation5 + $0x264] ss:$8 sps:$4 sm:$0xff]  }
  0x68   :  { %904 = vmatprep.subr.bf16.mxu0 %v2347_v17  ;;  %v105_v14 = vpack.c.bf16 %v97_v10, %v89_v9  ;;  %v2427_v16 = vld [vmem:[#allocation5 + $0x214] ss:$8 sps:$4 sm:$0xff]   ;;  %v108_v17 = vpack.c.bf16 %v100_v13, %v92_v12  ;;  %v2437_v37 = vld [vmem:[#allocation5 + $0x250] ss:$8 sps:$4 sm:$0xff]   ;;  %v99_v12 = vld [vmem:[#allocation2 + $0x60] sm:$0xff] }
  0x69   :  { %v2533_v36 = vld [vmem:[#allocation7 + $0xa4] ss:$16 sps:$4 sm:$0xff]   ;;  %v2535_v39 = vld [vmem:[#allocation7 + $0xa0] ss:$16 sps:$4 sm:$0xff]  }
  0x6a   :  { %v2469_v9 = vld [vmem:[#allocation5 + $0x2f4] ss:$8 sps:$4 sm:$0xff]   ;;  %v2467_v10 = vld [vmem:[#allocation5 + $0x2f0] ss:$8 sps:$4 sm:$0xff]   ;;  %v2472_v13 = vld [vmem:[#allocation5 + $0x304] ss:$8 sps:$4 sm:$0xff]  }
  0x6b   :  { %905 = vmatpush1.bf16.msra.mxu0 %v2349_v18  ;;  %v2518_v18 = vld [vmem:[#allocation7 + $0x4] ss:$16 sps:$4 sm:$0xff]  }
  0x6c   :  { %906 = vmatprep.subr.bf16.mxu0 %v2350_v19  ;;  %v2520_v19 = vld [vmem:[#allocation7] ss:$16 sps:$4 sm:$0xff]   ;;  %1469 = vmatprep.subr.bf16.mxu1 %v2518_v18 }
  0x6d   :  { %1470 = vmatpush1.bf16.msra.mxu1 %v2520_v19  ;;  %v2475_v19 = vld [vmem:[#allocation5 + $0x314] ss:$8 sps:$4 sm:$0xff]  }
  0x6f   :  { %907 = vmatpush1.bf16.msra.mxu0 %v2352_v20  ;;  %v2521_v20 = vld [vmem:[#allocation7 + $0x24] ss:$16 sps:$4 sm:$0xff]  }
  0x70   :  { %908 = vmatprep.subr.bf16.mxu0 %v2353_v21  ;;  %v2425_v21 = vld [vmem:[#allocation5 + $0x210] ss:$8 sps:$4 sm:$0xff]   ;;  %1471 = vmatprep.subr.bf16.mxu1 %v2521_v20 }
  0x71   :  { %v2473_v20 = vld [vmem:[#allocation5 + $0x310] ss:$8 sps:$4 sm:$0xff]  }
  0x73   :  { %909 = vmatpush1.bf16.msra.mxu0 %v2355_v22  ;;  %v2430_v22 = vld [vmem:[#allocation5 + $0x224] ss:$8 sps:$4 sm:$0xff]  }
  0x74   :  { %910 = vmatprep.subr.bf16.mxu0 %v2356_v23  ;;  %v2523_v23 = vld [vmem:[#allocation7 + $0x20] ss:$16 sps:$4 sm:$0xff]  }
  0x75   :  { %1472 = vmatpush1.bf16.msra.mxu1 %v2523_v23  ;;  %v2481_v23 = vld [vmem:[#allocation5 + $0x334] ss:$8 sps:$4 sm:$0xff]  }
  0x77   :  { %911 = vmatpush1.bf16.msra.mxu0 %v2358_v24  ;;  %v2524_v24 = vld [vmem:[#allocation7 + $0x44] ss:$16 sps:$4 sm:$0xff]  }
  0x78   :  { %912 = vmatprep.subr.bf16.mxu0 %v2359_v25  ;;  %v2428_v25 = vld [vmem:[#allocation5 + $0x220] ss:$8 sps:$4 sm:$0xff]   ;;  %1473 = vmatprep.subr.bf16.mxu1 %v2524_v24  ;;  %v2479_v24 = vld [vmem:[#allocation5 + $0x330] ss:$8 sps:$4 sm:$0xff]  }
  0x7b   :  { %913 = vmatpush1.bf16.msra.mxu0 %v2361_v26  ;;  %v2433_v26 = vld [vmem:[#allocation5 + $0x234] ss:$8 sps:$4 sm:$0xff]  }
  0x7c   :  { %914 = vmatprep.subr.bf16.mxu0 %v2362_v27  ;;  %v2526_v27 = vld [vmem:[#allocation7 + $0x40] ss:$16 sps:$4 sm:$0xff]  }
  0x7d   :  { %1474 = vmatpush1.bf16.msra.mxu1 %v2526_v27  ;;  %v2487_v27 = vld [vmem:[#allocation5 + $0x354] ss:$8 sps:$4 sm:$0xff]  }
  0x7f   :  { %915 = vmatpush1.bf16.msra.mxu0 %v2364_v28  ;;  %v2527_v28 = vld [vmem:[#allocation7 + $0x64] ss:$16 sps:$4 sm:$0xff]  }
  0x80   :  { %916 = vmatprep.subr.bf16.mxu0 %v2365_v29  ;;  %v2431_v29 = vld [vmem:[#allocation5 + $0x230] ss:$8 sps:$4 sm:$0xff]   ;;  %1475 = vmatprep.subr.bf16.mxu1 %v2527_v28 }
  0x81   :  { %v2485_v28 = vld [vmem:[#allocation5 + $0x350] ss:$8 sps:$4 sm:$0xff]  }
  0x83   :  { %917 = vmatpush1.bf16.msra.mxu0 %v2367_v30  ;;  %v2436_v30 = vld [vmem:[#allocation5 + $0x244] ss:$8 sps:$4 sm:$0xff]  }
  0x84   :  { %918 = vmatprep.subr.bf16.mxu0 %v2368_v31  ;;  %v2529_v31 = vld [vmem:[#allocation7 + $0x60] ss:$16 sps:$4 sm:$0xff]  }
  0x85   :  { %1476 = vmatpush1.bf16.msra.mxu1 %v2529_v31  ;;  %v2493_v31 = vld [vmem:[#allocation5 + $0x374] ss:$8 sps:$4 sm:$0xff]  }
  0x87   :  { %919 = vmatpush1.bf16.msra.mxu0 %v2370_v32  ;;  %v2530_v32 = vld [vmem:[#allocation7 + $0x84] ss:$16 sps:$4 sm:$0xff]  }
  0x88   :  { %920 = vmatprep.subr.bf16.mxu0 %v2371_v33  ;;  %v2434_v33 = vld [vmem:[#allocation5 + $0x240] ss:$8 sps:$4 sm:$0xff]   ;;  %1477 = vmatprep.subr.bf16.mxu1 %v2530_v32  ;;  %v2491_v32 = vld [vmem:[#allocation5 + $0x370] ss:$8 sps:$4 sm:$0xff]  }
  0x8b   :  { %921 = vmatpush1.bf16.msra.mxu0 %v2373_v34  ;;  %v2439_v34 = vld [vmem:[#allocation5 + $0x254] ss:$8 sps:$4 sm:$0xff]  }
  0x8c   :  { %933 = vmatprep.subr.bf16.mxu0 %v2376_v35  ;;  %v2532_v35 = vld [vmem:[#allocation7 + $0x80] ss:$16 sps:$4 sm:$0xff]  }
  0x8d   :  { %1478 = vmatpush1.bf16.msra.mxu1 %v2532_v35  ;;  %v2499_v35 = vld [vmem:[#allocation5 + $0x394] ss:$8 sps:$4 sm:$0xff]  }
  0x8e   :  { %923 = vmatmul.mubr.bf16.vlgmr.msra.gmra.mrb[0].mxu0 %v103_v40  ;;  %1479 = vmatprep.subr.bf16.mxu1 %v2533_v36  ;;  %v2536_v40 = vld [vmem:[#allocation7 + $0xc4] ss:$16 sps:$4 sm:$0xff]   ;;  %v2497_v36 = vld [vmem:[#allocation5 + $0x390] ss:$8 sps:$4 sm:$0xff]  }
  0x8f   :  { %934 = vmatpush1.bf16.msra.mxu0 %v2374_v41  ;;  %965 = vmatprep.mubr.bf16.mxu0 %v106_v42  ;;  %v2440_v41 = vld [vmem:[#allocation5 + $0x260] ss:$8 sps:$4 sm:$0xff]   ;;  %v2445_v42 = vld [vmem:[#allocation5 + $0x274] ss:$8 sps:$4 sm:$0xff]  }
  0x90   :  { %935 = vmatprep.subr.bf16.mxu0 %v2379_v43  ;;  %v2538_v43 = vld [vmem:[#allocation7 + $0xc0] ss:$16 sps:$4 sm:$0xff]  }
  0x91   :  { %1480 = vmatpush1.bf16.msra.mxu1 %v2535_v39  ;;  %v2505_v39 = vld [vmem:[#allocation5 + $0x3b4] ss:$8 sps:$4 sm:$0xff]  }
  0x92   :  { %1481 = vmatprep.subr.bf16.mxu1 %v2536_v40  ;;  %v2503_v40 = vld [vmem:[#allocation5 + $0x3b0] ss:$8 sps:$4 sm:$0xff]  }
  0x93   :  { %936 = vmatpush1.bf16.msra.mxu0 %v2377_v44  ;;  %v2539_v44 = vld [vmem:[#allocation7 + $0xe4] ss:$16 sps:$4 sm:$0xff]  }
  0x94   :  { %937 = vmatprep.subr.bf16.mxu0 %v2382_v45  ;;  %v2443_v45 = vld [vmem:[#allocation5 + $0x270] ss:$8 sps:$4 sm:$0xff]  }
  0x95   :  { %1482 = vmatpush1.bf16.msra.mxu1 %v2538_v43  ;;  %v2511_v43 = vld [vmem:[#allocation5 + $0x3d4] ss:$8 sps:$4 sm:$0xff]  }
  0x96   :  { %1483 = vmatprep.subr.bf16.mxu1 %v2539_v44  ;;  %v2509_v44 = vld [vmem:[#allocation5 + $0x3d0] ss:$8 sps:$4 sm:$0xff]  }
  0x97   :  { %938 = vmatpush1.bf16.msra.mxu0 %v2380_v46  ;;  %v2448_v46 = vld [vmem:[#allocation5 + $0x284] ss:$8 sps:$4 sm:$0xff]  }
  0x98   :  { %939 = vmatprep.subr.bf16.mxu0 %v2385_v47  ;;  %v2541_v47 = vld [vmem:[#allocation7 + $0xe0] ss:$16 sps:$4 sm:$0xff]  }
  0x99   :  { %1484 = vmatpush1.bf16.msra.mxu1 %v2541_v47  ;;  %v2517_v47 = vld [vmem:[#allocation5 + $0x3f4] ss:$8 sps:$4 sm:$0xff]  }
  0x9b   :  { %940 = vmatpush1.bf16.msra.mxu0 %v2383_v48  ;;  %v2542_v48 = vld [vmem:[#allocation7 + $0x104] ss:$16 sps:$4 sm:$0xff]  }
  0x9c   :  { %941 = vmatprep.subr.bf16.mxu0 %v2388_v49  ;;  %v2446_v49 = vld [vmem:[#allocation5 + $0x280] ss:$8 sps:$4 sm:$0xff]   ;;  %1485 = vmatprep.subr.bf16.mxu1 %v2542_v48  ;;  %v2515_v48 = vld [vmem:[#allocation5 + $0x3f0] ss:$8 sps:$4 sm:$0xff]  }
  0x9f   :  { %942 = vmatpush1.bf16.msra.mxu0 %v2386_v50  ;;  %v2451_v50 = vld [vmem:[#allocation5 + $0x294] ss:$8 sps:$4 sm:$0xff]  }
  0xa0   :  { %943 = vmatprep.subr.bf16.mxu0 %v2391_v51  ;;  %v2544_v51 = vld [vmem:[#allocation7 + $0x100] ss:$16 sps:$4 sm:$0xff]  }
  0xa1   :  { %1486 = vmatpush1.bf16.msra.mxu1 %v2544_v51 }
  0xa3   :  { %944 = vmatpush1.bf16.msra.mxu0 %v2389_v52  ;;  %v2545_v52 = vld [vmem:[#allocation7 + $0x124] ss:$16 sps:$4 sm:$0xff]  }
  0xa4   :  { %945 = vmatprep.subr.bf16.mxu0 %v2394_v53  ;;  %v2449_v53 = vld [vmem:[#allocation5 + $0x290] ss:$8 sps:$4 sm:$0xff]   ;;  %1487 = vmatprep.subr.bf16.mxu1 %v2545_v52  ;;  %v2560_v52 = vld [vmem:[#allocation7 + $0x1c4] ss:$16 sps:$4 sm:$0xff]  }
  0xa7   :  { %946 = vmatpush1.bf16.msra.mxu0 %v2392_v54  ;;  %v2454_v54 = vld [vmem:[#allocation5 + $0x2a4] ss:$8 sps:$4 sm:$0xff]  }
  0xa8   :  { %947 = vmatprep.subr.bf16.mxu0 %v2397_v55  ;;  %v2547_v55 = vld [vmem:[#allocation7 + $0x120] ss:$16 sps:$4 sm:$0xff]  }
  0xa9   :  { %1488 = vmatpush1.bf16.msra.mxu1 %v2547_v55  ;;  %v2565_v55 = vld [vmem:[#allocation7 + $0x1e0] ss:$16 sps:$4 sm:$0xff]  }
  0xab   :  { %948 = vmatpush1.bf16.msra.mxu0 %v2395_v56  ;;  %v2548_v56 = vld [vmem:[#allocation7 + $0x144] ss:$16 sps:$4 sm:$0xff]  }
  0xac   :  { %949 = vmatprep.subr.bf16.mxu0 %v2400_v57  ;;  %v2452_v57 = vld [vmem:[#allocation5 + $0x2a0] ss:$8 sps:$4 sm:$0xff]   ;;  %1489 = vmatprep.subr.bf16.mxu1 %v2548_v56  ;;  %v2568_v56 = vld [vmem:[#allocation7 + $0xc] ss:$16 sps:$4 sm:$0xff]  }
  0xaf   :  { %950 = vmatpush1.bf16.msra.mxu0 %v2398_v58  ;;  %v2457_v58 = vld [vmem:[#allocation5 + $0x2b4] ss:$8 sps:$4 sm:$0xff]  }
  0xb0   :  { %951 = vmatprep.subr.bf16.mxu0 %v2403_v59  ;;  %v2550_v59 = vld [vmem:[#allocation7 + $0x140] ss:$16 sps:$4 sm:$0xff]  }
  0xb1   :  { %1490 = vmatpush1.bf16.msra.mxu1 %v2550_v59 }
  0xb3   :  { %952 = vmatpush1.bf16.msra.mxu0 %v2401_v60  ;;  %v2551_v60 = vld [vmem:[#allocation7 + $0x164] ss:$16 sps:$4 sm:$0xff]  }
  0xb4   :  { %953 = vmatprep.subr.bf16.mxu0 %v2406_v61  ;;  %v2455_v61 = vld [vmem:[#allocation5 + $0x2b0] ss:$8 sps:$4 sm:$0xff]   ;;  %1491 = vmatprep.subr.bf16.mxu1 %v2551_v60  ;;  %v84_v60 = vld [vmem:[%s3020_s5] sm:$0x3] }
  0xb7   :  { %954 = vmatpush1.bf16.msra.mxu0 %v2404_v62  ;;  %v2460_v62 = vld [vmem:[#allocation5 + $0x2c4] ss:$8 sps:$4 sm:$0xff]  }
  0xb8   :  { %955 = vmatprep.subr.bf16.mxu0 %v2409_v63  ;;  %v2553_v63 = vld [vmem:[#allocation7 + $0x160] ss:$16 sps:$4 sm:$0xff]  }
  0xb9   :  { %1492 = vmatpush1.bf16.msra.mxu1 %v2553_v63 }
  0xbb   :  { %956 = vmatpush1.bf16.msra.mxu0 %v2407_v0  ;;  %v2554_v0 = vld [vmem:[#allocation7 + $0x184] ss:$16 sps:$4 sm:$0xff]  }
  0xbc   :  { %957 = vmatprep.subr.bf16.mxu0 %v2412_v1  ;;  %v2458_v1 = vld [vmem:[#allocation5 + $0x2c0] ss:$8 sps:$4 sm:$0xff]   ;;  %1493 = vmatprep.subr.bf16.mxu1 %v2554_v0 }
  0xbf   :  { %958 = vmatpush1.bf16.msra.mxu0 %v2410_v2  ;;  %v2463_v2 = vld [vmem:[#allocation5 + $0x2d4] ss:$8 sps:$4 sm:$0xff]  }
  0xc0   :  { %959 = vmatprep.subr.bf16.mxu0 %v2415_v3  ;;  %v2556_v3 = vld [vmem:[#allocation7 + $0x180] ss:$16 sps:$4 sm:$0xff]  }
  0xc1   :  { %1494 = vmatpush1.bf16.msra.mxu1 %v2556_v3 }
  0xc3   :  { %960 = vmatpush1.bf16.msra.mxu0 %v2413_v4  ;;  %v2557_v4 = vld [vmem:[#allocation7 + $0x1a4] ss:$16 sps:$4 sm:$0xff]  }
  0xc4   :  { %961 = vmatprep.subr.bf16.mxu0 %v2418_v5  ;;  %v2461_v5 = vld [vmem:[#allocation5 + $0x2d0] ss:$8 sps:$4 sm:$0xff]   ;;  %1495 = vmatprep.subr.bf16.mxu1 %v2557_v4 }
  0xc7   :  { %962 = vmatpush1.bf16.msra.mxu0 %v2416_v6  ;;  %v2466_v6 = vld [vmem:[#allocation5 + $0x2e4] ss:$8 sps:$4 sm:$0xff]  }
  0xc8   :  { %963 = vmatprep.subr.bf16.mxu0 %v2421_v7  ;;  %v2559_v7 = vld [vmem:[#allocation7 + $0x1a0] ss:$16 sps:$4 sm:$0xff]  }
  0xc9   :  { %1496 = vmatpush1.bf16.msra.mxu1 %v2559_v7 }
  0xca   :  { %1497 = vmatprep.subr.bf16.mxu1 %v2560_v52  ;;  %v2625_v52 = vld [vmem:[#allocation8 + $0x28] sm:$0xff]  }
  0xcb   :  { %964 = vmatpush1.bf16.msra.mxu0 %v2419_v8  ;;  %v2464_v8 = vld [vmem:[#allocation5 + $0x2e0] ss:$8 sps:$4 sm:$0xff]  }
  0xcc   :  { %976 = vmatprep.subr.bf16.mxu0 %v2424_v11  ;;  %v91_v11 = vld [vmem:[#allocation2 + $0x20] sm:$0xff] }
  0xce   :  { %966 = vmatmul.mubr.bf16.vlgmr.msra.gmra.mrb[0].mxu0 %v105_v14  ;;  %v94_v14 = vld [vmem:[#allocation2 + $0x38] sm:$0xff] }
  0xcf   :  { %977 = vmatpush1.bf16.msra.mxu0 %v2422_v15  ;;  %1008 = vmatprep.mubr.bf16.mxu0 %v108_v17  ;;  %v102_v15 = vld [vmem:[#allocation2 + $0x78] sm:$0xff]  ;;  %v2470_v17 = vld [vmem:[#allocation5 + $0x300] ss:$8 sps:$4 sm:$0xff]  }
  0xd0   :  { %978 = vmatprep.subr.bf16.mxu0 %v2427_v16  ;;  %v107_v16 = vpack.c.bf16 %v99_v12, %v91_v11  ;;  %v110_v18 = vpack.c.bf16 %v102_v15, %v94_v14  ;;  %v2571_v11 = vld [vmem:[#allocation7 + $0x2c] ss:$16 sps:$4 sm:$0xff]   ;;  %v2569_v12 = vld [vmem:[#allocation7 + $0x28] ss:$16 sps:$4 sm:$0xff]  }
  0xd1   :  { %v2572_v14 = vld [vmem:[#allocation7 + $0x48] ss:$16 sps:$4 sm:$0xff]   ;;  %v2577_v15 = vld [vmem:[#allocation7 + $0x6c] ss:$16 sps:$4 sm:$0xff]  }
  0xd3   :  { %979 = vmatpush1.bf16.msra.mxu0 %v2425_v21  ;;  %v2478_v21 = vld [vmem:[#allocation5 + $0x324] ss:$8 sps:$4 sm:$0xff]  }
  0xd4   :  { %980 = vmatprep.subr.bf16.mxu0 %v2430_v22  ;;  %v2476_v22 = vld [vmem:[#allocation5 + $0x320] ss:$8 sps:$4 sm:$0xff]  }
  0xd7   :  { %981 = vmatpush1.bf16.msra.mxu0 %v2428_v25  ;;  %v2484_v25 = vld [vmem:[#allocation5 + $0x344] ss:$8 sps:$4 sm:$0xff]  }
  0xd8   :  { %982 = vmatprep.subr.bf16.mxu0 %v2433_v26  ;;  %v2482_v26 = vld [vmem:[#allocation5 + $0x340] ss:$8 sps:$4 sm:$0xff]  }
  0xdb   :  { %983 = vmatpush1.bf16.msra.mxu0 %v2431_v29  ;;  %v2490_v29 = vld [vmem:[#allocation5 + $0x364] ss:$8 sps:$4 sm:$0xff]  }
  0xdc   :  { %984 = vmatprep.subr.bf16.mxu0 %v2436_v30  ;;  %v2488_v30 = vld [vmem:[#allocation5 + $0x360] ss:$8 sps:$4 sm:$0xff]  }
  0xdf   :  { %985 = vmatpush1.bf16.msra.mxu0 %v2434_v33  ;;  %v2496_v33 = vld [vmem:[#allocation5 + $0x384] ss:$8 sps:$4 sm:$0xff]  }
  0xe0   :  { %986 = vmatprep.subr.bf16.mxu0 %v2439_v34  ;;  %v2494_v34 = vld [vmem:[#allocation5 + $0x380] ss:$8 sps:$4 sm:$0xff]  }
  0xe3   :  { %987 = vmatpush1.bf16.msra.mxu0 %v2437_v37  ;;  %v2502_v37 = vld [vmem:[#allocation5 + $0x3a4] ss:$8 sps:$4 sm:$0xff]  }
  0xe4   :  { %988 = vmatprep.subr.bf16.mxu0 %v2442_v38  ;;  %v2500_v38 = vld [vmem:[#allocation5 + $0x3a0] ss:$8 sps:$4 sm:$0xff]  }
  0xe7   :  { %989 = vmatpush1.bf16.msra.mxu0 %v2440_v41  ;;  %v2508_v41 = vld [vmem:[#allocation5 + $0x3c4] ss:$8 sps:$4 sm:$0xff]  }
  0xe8   :  { %990 = vmatprep.subr.bf16.mxu0 %v2445_v42  ;;  %v2506_v42 = vld [vmem:[#allocation5 + $0x3c0] ss:$8 sps:$4 sm:$0xff]  }
  0xeb   :  { %991 = vmatpush1.bf16.msra.mxu0 %v2443_v45  ;;  %v2514_v45 = vld [vmem:[#allocation5 + $0x3e4] ss:$8 sps:$4 sm:$0xff]  }
  0xec   :  { %992 = vmatprep.subr.bf16.mxu0 %v2448_v46  ;;  %v2512_v46 = vld [vmem:[#allocation5 + $0x3e0] ss:$8 sps:$4 sm:$0xff]  }
  0xef   :  { %993 = vmatpush1.bf16.msra.mxu0 %v2446_v49  ;;  %v93_v49 = vld [vmem:[#allocation2 + $0x30] sm:$0xff] }
  0xf0   :  { %994 = vmatprep.subr.bf16.mxu0 %v2451_v50  ;;  %v101_v50 = vld [vmem:[#allocation2 + $0x70] sm:$0xff] }
  0xf1   :  { %v109_v51 = vpack.c.bf16 %v101_v50, %v93_v49  ;;  %v2622_v49 = vld [vmem:[#allocation8 + $0x60] sm:$0xff]  }
  0xf2   :  { %v2623_v50 = vld [vmem:[#allocation8 + $0x20] sm:$0xff]  }
  0xf3   :  { %995 = vmatpush1.bf16.msra.mxu0 %v2449_v53  ;;  %v2562_v53 = vld [vmem:[#allocation7 + $0x1c0] ss:$16 sps:$4 sm:$0xff]  }
  0xf4   :  { %996 = vmatprep.subr.bf16.mxu0 %v2454_v54  ;;  %1498 = vmatpush1.bf16.msra.mxu1 %v2562_v53  ;;  %v2563_v54 = vld [vmem:[#allocation7 + $0x1e4] ss:$16 sps:$4 sm:$0xff]  }
  0xf5   :  { %1499 = vmatprep.subr.bf16.mxu1 %v2563_v54  ;;  %v2626_v53 = vld [vmem:[#allocation8 + $0x70] sm:$0xff]  }
  0xf6   :  { %v2627_v54 = vld [vmem:[#allocation8 + $0x30] sm:$0xff]  }
  0xf7   :  { %997 = vmatpush1.bf16.msra.mxu0 %v2452_v57  ;;  %v240_v57 = vlaneseq }
  0xf8   :  { %998 = vmatprep.subr.bf16.mxu0 %v2457_v58  ;;  %1500 = vmatpush1.bf16.msra.mxu1 %v2565_v55  ;;  %v2628_v55 = vld [vmem:[#allocation8 + $0x78] sm:$0xff]  }
  0xf9   :  { %1512 = vmatprep.subr.bf16.mxu1 %v2568_v56  ;;  %v2929_v58 = vshrl.u32 %v240_v57, 7  ;;  %v2629_v56 = vld [vmem:[#allocation8 + $0x38] sm:$0xff]  }
  0xfb   :  { %999 = vmatpush1.bf16.msra.mxu0 %v2455_v61  ;;  %v242_v59 = vsub.s32 0, %v2929_v58  ;;  %v246_v61 = vsub.s32 1, %v2929_v58 }
  0xfc   :  { %1000 = vmatprep.subr.bf16.mxu0 %v2460_v62 }
  0xfd   :  { %v243_v62 = vrot.slane %v84_v60, %v242_v59  ;;  %v247_v0 = vrot.slane %v84_v60, %v246_v61  ;;  %v2630_v60 = vld [vmem:[#allocation8 + $0xc0] sm:$0xff]  }
  0xff   :  { %1001 = vmatpush1.bf16.msra.mxu0 %v2458_v1 }
 0x100   :  { %1002 = vmatprep.subr.bf16.mxu0 %v2463_v2 }
 0x103   :  { %1003 = vmatpush1.bf16.msra.mxu0 %v2461_v5 }
 0x104   :  { %1004 = vmatprep.subr.bf16.mxu0 %v2466_v6 }
 0x107   :  { %1005 = vmatpush1.bf16.msra.mxu0 %v2464_v8 }
 0x108   :  { %1006 = vmatprep.subr.bf16.mxu0 %v2469_v9 }
 0x10b   :  { %1007 = vmatpush1.bf16.msra.mxu0 %v2467_v10  ;;  %v2566_v10 = vld [vmem:[#allocation7 + $0x8] ss:$16 sps:$4 sm:$0xff]  }
 0x10c   :  { %1019 = vmatprep.subr.bf16.mxu0 %v2472_v13  ;;  %v2574_v13 = vld [vmem:[#allocation7 + $0x4c] ss:$16 sps:$4 sm:$0xff]  }
 0x10e   :  { %1009 = vmatmul.mubr.bf16.vlgmr.msra.gmra.mrb[0].mxu0 %v107_v16  ;;  %v2575_v16 = vld [vmem:[#allocation7 + $0x68] ss:$16 sps:$4 sm:$0xff]  }
 0x10f   :  { %1020 = vmatpush1.bf16.msra.mxu0 %v2470_v17  ;;  %1051 = vmatprep.mubr.bf16.mxu0 %v110_v18  ;;  %v2580_v17 = vld [vmem:[#allocation7 + $0x8c] ss:$16 sps:$4 sm:$0xff]   ;;  %v2578_v18 = vld [vmem:[#allocation7 + $0x88] ss:$16 sps:$4 sm:$0xff]  }
 0x110   :  { %1021 = vmatprep.subr.bf16.mxu0 %v2475_v19  ;;  %v2583_v19 = vld [vmem:[#allocation7 + $0xac] ss:$16 sps:$4 sm:$0xff]  }
 0x113   :  { %1022 = vmatpush1.bf16.msra.mxu0 %v2473_v20  ;;  %v2581_v20 = vld [vmem:[#allocation7 + $0xa8] ss:$16 sps:$4 sm:$0xff]  }
 0x114   :  { %1023 = vmatprep.subr.bf16.mxu0 %v2478_v21  ;;  %v2586_v21 = vld [vmem:[#allocation7 + $0xcc] ss:$16 sps:$4 sm:$0xff]  }
 0x117   :  { %1024 = vmatpush1.bf16.msra.mxu0 %v2476_v22  ;;  %v2584_v22 = vld [vmem:[#allocation7 + $0xc8] ss:$16 sps:$4 sm:$0xff]  }
 0x118   :  { %1025 = vmatprep.subr.bf16.mxu0 %v2481_v23  ;;  %v2589_v23 = vld [vmem:[#allocation7 + $0xec] ss:$16 sps:$4 sm:$0xff]  }
 0x11b   :  { %1026 = vmatpush1.bf16.msra.mxu0 %v2479_v24  ;;  %v2587_v24 = vld [vmem:[#allocation7 + $0xe8] ss:$16 sps:$4 sm:$0xff]  }
 0x11c   :  { %1027 = vmatprep.subr.bf16.mxu0 %v2484_v25  ;;  %v2592_v25 = vld [vmem:[#allocation7 + $0x10c] ss:$16 sps:$4 sm:$0xff]  }
 0x11f   :  { %1028 = vmatpush1.bf16.msra.mxu0 %v2482_v26  ;;  %v2590_v26 = vld [vmem:[#allocation7 + $0x108] ss:$16 sps:$4 sm:$0xff]  }
 0x120   :  { %1029 = vmatprep.subr.bf16.mxu0 %v2487_v27  ;;  %v2595_v27 = vld [vmem:[#allocation7 + $0x12c] ss:$16 sps:$4 sm:$0xff]  }
 0x123   :  { %1030 = vmatpush1.bf16.msra.mxu0 %v2485_v28  ;;  %v2593_v28 = vld [vmem:[#allocation7 + $0x128] ss:$16 sps:$4 sm:$0xff]  }
 0x124   :  { %1031 = vmatprep.subr.bf16.mxu0 %v2490_v29  ;;  %v2598_v29 = vld [vmem:[#allocation7 + $0x14c] ss:$16 sps:$4 sm:$0xff]  }
 0x127   :  { %1032 = vmatpush1.bf16.msra.mxu0 %v2488_v30  ;;  %v2596_v30 = vld [vmem:[#allocation7 + $0x148] ss:$16 sps:$4 sm:$0xff]  }
 0x128   :  { %1033 = vmatprep.subr.bf16.mxu0 %v2493_v31  ;;  %v2601_v31 = vld [vmem:[#allocation7 + $0x16c] ss:$16 sps:$4 sm:$0xff]  }
 0x12b   :  { %1034 = vmatpush1.bf16.msra.mxu0 %v2491_v32  ;;  %v2599_v32 = vld [vmem:[#allocation7 + $0x168] ss:$16 sps:$4 sm:$0xff]  }
 0x12c   :  { %1035 = vmatprep.subr.bf16.mxu0 %v2496_v33  ;;  %v2604_v33 = vld [vmem:[#allocation7 + $0x18c] ss:$16 sps:$4 sm:$0xff]  }
 0x12f   :  { %1036 = vmatpush1.bf16.msra.mxu0 %v2494_v34  ;;  %v2602_v34 = vld [vmem:[#allocation7 + $0x188] ss:$16 sps:$4 sm:$0xff]  }
 0x130   :  { %1037 = vmatprep.subr.bf16.mxu0 %v2499_v35  ;;  %v2607_v35 = vld [vmem:[#allocation7 + $0x1ac] ss:$16 sps:$4 sm:$0xff]  }
 0x133   :  { %1038 = vmatpush1.bf16.msra.mxu0 %v2497_v36  ;;  %v2605_v36 = vld [vmem:[#allocation7 + $0x1a8] ss:$16 sps:$4 sm:$0xff]  }
 0x134   :  { %1039 = vmatprep.subr.bf16.mxu0 %v2502_v37  ;;  %v2610_v37 = vld [vmem:[#allocation7 + $0x1cc] ss:$16 sps:$4 sm:$0xff]  }
 0x137   :  { %1040 = vmatpush1.bf16.msra.mxu0 %v2500_v38  ;;  %v2608_v38 = vld [vmem:[#allocation7 + $0x1c8] ss:$16 sps:$4 sm:$0xff]  }
 0x138   :  { %1041 = vmatprep.subr.bf16.mxu0 %v2505_v39  ;;  %v2613_v39 = vld [vmem:[#allocation7 + $0x1ec] ss:$16 sps:$4 sm:$0xff]  }
 0x13b   :  { %1042 = vmatpush1.bf16.msra.mxu0 %v2503_v40  ;;  %v2611_v40 = vld [vmem:[#allocation7 + $0x1e8] ss:$16 sps:$4 sm:$0xff]  }
 0x13c   :  { %1043 = vmatprep.subr.bf16.mxu0 %v2508_v41  ;;  %v2614_v41 = vld [vmem:[#allocation8 + $0x40] sm:$0xff]  }
 0x13f   :  { %1044 = vmatpush1.bf16.msra.mxu0 %v2506_v42  ;;  %v2615_v42 = vld [vmem:[#allocation8] sm:$0xff]  }
 0x140   :  { %1045 = vmatprep.subr.bf16.mxu0 %v2511_v43  ;;  %v2616_v43 = vld [vmem:[#allocation8 + $0x48] sm:$0xff]  }
 0x143   :  { %1046 = vmatpush1.bf16.msra.mxu0 %v2509_v44  ;;  %v2617_v44 = vld [vmem:[#allocation8 + $0x8] sm:$0xff]  }
 0x144   :  { %1047 = vmatprep.subr.bf16.mxu0 %v2514_v45  ;;  %v2618_v45 = vld [vmem:[#allocation8 + $0x50] sm:$0xff]  }
 0x147   :  { %1048 = vmatpush1.bf16.msra.mxu0 %v2512_v46  ;;  %v2619_v46 = vld [vmem:[#allocation8 + $0x10] sm:$0xff]  }
 0x148   :  { %1049 = vmatprep.subr.bf16.mxu0 %v2517_v47  ;;  %v2620_v47 = vld [vmem:[#allocation8 + $0x58] sm:$0xff]  }
 0x14b   :  { %1050 = vmatpush1.bf16.msra.mxu0 %v2515_v48  ;;  %v2621_v48 = vld [vmem:[#allocation8 + $0x18] sm:$0xff]  }
 0x14e   :  { %1052 = vmatmul.mubr.bf16.vlgmr.msra.gmra.mrb[0].mxu0 %v109_v51  ;;  %v2624_v51 = vld [vmem:[#allocation8 + $0x68] sm:$0xff]  }
 0x221   :  { %v1053_v63 = vpop.f32.mrb[0].mxu0 }
 0x222   :  { %v1055_v1 = vpop.f32.mrb[1].mxu0  ;;  %v2293_v3 = vadd.f32 %v1053_v63, %v243_v62  ;;  %v2821_v63 = vmov 0  }
 0x223   :  { %v1057_v2 = vpop.f32.mrb[2].mxu0  ;;  %v2294_v6 = vadd.f32 %v1055_v1, %v247_v0  ;;  %2325 = vset.pattern.permute.xlu0 %v2821_v63  ;;  %v85_v1 = vld [vmem:[%s3020_s5 + $0x2] sm:$0xf] }
 0x224   :  { %v2295_v4 = vadd.f32 %v1057_v2, %v243_v62  ;;  %v1059_v5 = vpop.f32.mrb[3].mxu0  ;;  %v1929_v62 = vld [vmem:[%s3015_s0] sm:$0xff]  ;;  %v1132_v2 = vrot.slane %v85_v1, %v242_v59  ;;  %v2633_v59 = vld [vmem:[#allocation8 + $0x88] sm:$0xff]  }
 0x225   :  { %v2296_v7 = vadd.f32 %v1059_v5, %v247_v0  ;;  %1935 = vperm.xlu0 %2325, %v1929_v62   ;;  %v1930_v0 = vld [vmem:[%s3015_s0 + $0x8] sm:$0xff]  ;;  %s2823_s0 = smov [#allocation10]  }
 0x226   :  { %v2940_v8 = vpack.c.bf16 %v2295_v4, %v2293_v3  ;;  %v1136_v3 = vrot.slane %v85_v1, %v246_v61  ;;  %v2634_v61 = vld [vmem:[#allocation8 + $0xd0] sm:$0xff]   ;;  %s1967_s24 = sshll.u32 %s2823_s0, 4  ;;  %s1968_s24 = int_to_ptr.vmem [resolvable:$true] %s1967_s24 }
 0x227   :  { %v1063_v9 = vpack.c.bf16 %v2296_v7, %v2294_v6  ;;  %s2734_s25 = scalar_lea.vmem %s1968_s24, 512  ;;  %p2739_p5 = scmp.lt.s32.totalorder %s1968_s24, %s1968_s24 }
 0x228   :  { %p2735_p4 = scmp.ne.s32.totalorder %s1968_s24, %s2734_s25  ;;  %p2740_p6 = scmp.lt.s32.totalorder %s2734_s25, %s2734_s25 }
 0x229   :  { %1501 = vmatprep.mubr.bf16.mxu1 %v1063_v9  ;;  %1938 = vperm.xlu0 %2325, %v1930_v0  }
 0x22a   :  { %1502 = vmatmul.mubr.bf16.vlgmr.msra.gmra.mrb[0].mxu1 %v2940_v8  ;;  %p2741_p7 = por %p2740_p6, %p2739_p5 }
 0x22b   :  { %1513 = vmatpush1.bf16.msra.mxu1 %v2566_v10  ;;  %1544 = vmatprep.mubr.bf16.mxu1 %v1063_v9 }
 0x22c   :  { %1514 = vmatprep.subr.bf16.mxu1 %v2571_v11  ;;  %p2742_p8 = pnand %p2741_p7, %p2735_p4 }
 0x22f   :  { %1515 = vmatpush1.bf16.msra.mxu1 %v2569_v12 }
 0x230   :  { %1516 = vmatprep.subr.bf16.mxu1 %v2574_v13 }
 0x233   :  { %1517 = vmatpush1.bf16.msra.mxu1 %v2572_v14 }
 0x234   :  { %1518 = vmatprep.subr.bf16.mxu1 %v2577_v15 }
 0x237   :  { %1519 = vmatpush1.bf16.msra.mxu1 %v2575_v16  ;;  %v2631_v16 = vld [vmem:[#allocation8 + $0x80] sm:$0xff]  }
 0x238   :  { %1520 = vmatprep.subr.bf16.mxu1 %v2580_v17  ;;  %v2632_v17 = vld [vmem:[#allocation8 + $0xc8] sm:$0xff]  }
 0x23b   :  { %1521 = vmatpush1.bf16.msra.mxu1 %v2578_v18  ;;  %v2635_v18 = vld [vmem:[#allocation8 + $0x90] sm:$0xff]  }
 0x23c   :  { %1522 = vmatprep.subr.bf16.mxu1 %v2583_v19  ;;  %v2636_v19 = vld [vmem:[#allocation8 + $0xd8] sm:$0xff]  }
 0x23f   :  { %1523 = vmatpush1.bf16.msra.mxu1 %v2581_v20  ;;  %v2637_v20 = vld [vmem:[#allocation8 + $0x98] sm:$0xff]  }
 0x240   :  { %1524 = vmatprep.subr.bf16.mxu1 %v2586_v21  ;;  %v2638_v21 = vld [vmem:[#allocation8 + $0xe0] sm:$0xff]  }
 0x243   :  { %1525 = vmatpush1.bf16.msra.mxu1 %v2584_v22  ;;  %v2639_v22 = vld [vmem:[#allocation8 + $0xa0] sm:$0xff]  }
 0x244   :  { %1526 = vmatprep.subr.bf16.mxu1 %v2589_v23  ;;  %v2640_v23 = vld [vmem:[#allocation8 + $0xe8] sm:$0xff]  }
 0x247   :  { %1527 = vmatpush1.bf16.msra.mxu1 %v2587_v24  ;;  %v2641_v24 = vld [vmem:[#allocation8 + $0xa8] sm:$0xff]  }
 0x248   :  { %1528 = vmatprep.subr.bf16.mxu1 %v2592_v25  ;;  %v2642_v25 = vld [vmem:[#allocation8 + $0xf0] sm:$0xff]  }
 0x24b   :  { %1529 = vmatpush1.bf16.msra.mxu1 %v2590_v26  ;;  %v2643_v26 = vld [vmem:[#allocation8 + $0xb0] sm:$0xff]  }
 0x24c   :  { %1530 = vmatprep.subr.bf16.mxu1 %v2595_v27  ;;  %v2644_v27 = vld [vmem:[#allocation8 + $0xf8] sm:$0xff]  }
 0x24f   :  { %1531 = vmatpush1.bf16.msra.mxu1 %v2593_v28  ;;  %v2645_v28 = vld [vmem:[#allocation8 + $0xb8] sm:$0xff]  }
 0x250   :  { %1532 = vmatprep.subr.bf16.mxu1 %v2598_v29  ;;  %v1139_v29 = vsub.s32 2, %v2929_v58 }
 0x253   :  { %1533 = vmatpush1.bf16.msra.mxu1 %v2596_v30  ;;  %v1143_v30 = vsub.s32 3, %v2929_v58  ;;  %v1932_v58 = vand.u32 127, %v240_v57 }
 0x254   :  { %1534 = vmatprep.subr.bf16.mxu1 %v2601_v31  ;;  %v1140_v31 = vrot.slane %v85_v1, %v1139_v29 }
 0x257   :  { %1535 = vmatpush1.bf16.msra.mxu1 %v2599_v32  ;;  %v1144_v32 = vrot.slane %v85_v1, %v1143_v30 }
 0x258   :  { %1536 = vmatprep.subr.bf16.mxu1 %v2604_v33 }
 0x25b   :  { %1537 = vmatpush1.bf16.msra.mxu1 %v2602_v34 }
 0x25c   :  { %1538 = vmatprep.subr.bf16.mxu1 %v2607_v35 }
 0x25f   :  { %1539 = vmatpush1.bf16.msra.mxu1 %v2605_v36 }
 0x260   :  { %1540 = vmatprep.subr.bf16.mxu1 %v2610_v37 }
 0x263   :  { %1541 = vmatpush1.bf16.msra.mxu1 %v2608_v38 }
 0x264   :  { %1542 = vmatprep.subr.bf16.mxu1 %v2613_v39 }
 0x267   :  { %1543 = vmatpush1.bf16.msra.mxu1 %v2611_v40 }
 0x268   :  { %2249 = vmatprep.subr.bf16.mxu1 %v2614_v41 }
 0x26a   :  { %1545 = vmatmul.mubr.bf16.vlgmr.msra.gmra.mrb[4].mxu1 %v2940_v8 }
 0x26b   :  { %2250 = vmatpush3.bf16.msra.mxu1 %v2615_v42 }
 0x26c   :  { %2251 = vmatprep.subr.bf16.mxu1 %v2616_v43 }
 0x26f   :  { %2252 = vmatpush3.bf16.msra.mxu1 %v2617_v44 }
 0x270   :  { %2253 = vmatprep.subr.bf16.mxu1 %v2618_v45 }
 0x273   :  { %2254 = vmatpush3.bf16.msra.mxu1 %v2619_v46  ;;  %v1933_v46 = vadd.s32 128, %v1932_v58 }
 0x274   :  { %2255 = vmatprep.subr.bf16.mxu1 %v2620_v47  ;;  %v2822_v47 = vmov -1000.0  }
 0x277   :  { %2256 = vmatpush3.bf16.msra.mxu1 %v2621_v48 }
 0x278   :  { %2257 = vmatprep.subr.bf16.mxu1 %v2622_v49 }
 0x27b   :  { %2258 = vmatpush3.bf16.msra.mxu1 %v2623_v50 }
 0x27c   :  { %2259 = vmatprep.subr.bf16.mxu1 %v2624_v51 }
 0x27f   :  { %2260 = vmatpush3.bf16.msra.mxu1 %v2625_v52 }
 0x280   :  { %2261 = vmatprep.subr.bf16.mxu1 %v2626_v53 }
 0x283   :  { %2262 = vmatpush3.bf16.msra.mxu1 %v2627_v54 }
 0x284   :  { %2263 = vmatprep.subr.bf16.mxu1 %v2628_v55 }
 0x287   :  { %2264 = vmatpush3.bf16.msra.mxu1 %v2629_v56 }
 0x288   :  { %2271 = vmatprep.subr.bf16.mxu1 %v2630_v60 }
 0x2a4   :  { %v1936_v45 = vpop.permute.xlu0 %1935 }
 0x2a5   :  { %vm1940_vm0 = vcmp.eq.s32.totalorder %v1936_v45, %v1932_v58  ;;  %vm1941_vm1 = vcmp.eq.s32.totalorder %v1936_v45, %v1933_v46 }
 0x2a6   :  { %v1944_v48 = vsel %vm1940_vm0, 1000.0, %v2822_v47  ;;  %v1945_v50 = vsel %vm1941_vm1, 1000.0, %v2822_v47 }
 0x2a7   :  { %v2247_v51 = vpack.c.bf16 %v1945_v50, %v1944_v48 }
 0x2a8   :  { %v1939_v49 = vpop.permute.xlu0 %1938 }
 0x2a9   :  { %vm1942_vm2 = vcmp.eq.s32.totalorder %v1939_v49, %v1932_v58  ;;  %vm1943_vm3 = vcmp.eq.s32.totalorder %v1939_v49, %v1933_v46  ;;  %1960 = vst [vmem:[#allocation13] sm:$0xff] %v2247_v51 }
 0x2aa   :  { %v1946_v52 = vsel %vm1942_vm2, 1000.0, %v2822_v47  ;;  %v1947_v53 = vsel %vm1943_vm3, 1000.0, %v2822_v47 }
 0x2ab   :  { %v2248_v54 = vpack.c.bf16 %v1947_v53, %v1946_v52 }
 0x2ad   :  { %1961 = vst [vmem:[#allocation13 + $0x8] sm:$0xff] %v2248_v54 }
 0x2fd   :  { %v1503_v4 = vpop.f32.mrb[0].mxu1 }
 0x2fe   :  { %v1504_v5 = vadd.f32 %v1503_v4, %v1132_v2  ;;  %v1505_v6 = vpop.f32.mrb[1].mxu1 }
 0x2ff   :  { %v1506_v7 = vadd.f32 %v1505_v6, %v1136_v3  ;;  %v1507_v8 = vpop.f32.mrb[2].mxu1 }
 0x300   :  { %v1508_v9 = vadd.f32 %v1507_v8, %v1132_v2  ;;  %v1509_v10 = vpop.f32.mrb[3].mxu1 }
 0x301   :  { %v2243_v11 = vpack.c.bf16 %v1506_v7, %v1504_v5  ;;  %v1510_v12 = vadd.f32 %v1509_v10, %v1136_v3 }
 0x302   :  { %v1555_v13 = vpack.c.bf16 %v1508_v9, %v1504_v5 }
 0x303   :  { %1579 = vst [vmem:[#allocation10] sm:$0xff] %v2243_v11  ;;  %v1556_v14 = vpack.c.bf16 %v1510_v12, %v1506_v7  ;;  %v2245_v15 = vpack.c.bf16 %v1510_v12, %v1508_v9 }
 0x305   :  { %1581 = vst [vmem:[#allocation10 + $0x10] sm:$0xff] %v2245_v15  ;;  %1877 = vmatprep.mubr.bf16.mxu1 %v1556_v14 }
 0x306   :  { %1878 = vmatmul.mubr.bf16.vlgmr.msra.gmra.mrb[8].mxu1 %v1555_v13 }
 0x307   :  { %2272 = vmatpush3.bf16.msra.mxu1 %v2631_v16 }
 0x308   :  { %2273 = vmatprep.subr.bf16.mxu1 %v2632_v17 }
 0x30b   :  { %2274 = vmatpush3.bf16.msra.mxu1 %v2633_v59 }
 0x30c   :  { %2275 = vmatprep.subr.bf16.mxu1 %v2634_v61 }
 0x30f   :  { %2276 = vmatpush3.bf16.msra.mxu1 %v2635_v18 }
 0x310   :  { %2277 = vmatprep.subr.bf16.mxu1 %v2636_v19 }
 0x313   :  { %2278 = vmatpush3.bf16.msra.mxu1 %v2637_v20 }
 0x314   :  { %2279 = vmatprep.subr.bf16.mxu1 %v2638_v21 }
 0x317   :  { %2280 = vmatpush3.bf16.msra.mxu1 %v2639_v22 }
 0x318   :  { %2281 = vmatprep.subr.bf16.mxu1 %v2640_v23 }
 0x31b   :  { %2282 = vmatpush3.bf16.msra.mxu1 %v2641_v24 }
 0x31c   :  { %2283 = vmatprep.subr.bf16.mxu1 %v2642_v25 }
 0x31f   :  { %2284 = vmatpush3.bf16.msra.mxu1 %v2643_v26 }
 0x320   :  { %2285 = vmatprep.subr.bf16.mxu1 %v2644_v27 }
 0x323   :  { %2286 = vmatpush3.bf16.msra.mxu1 %v2645_v28 }
 0x33d   :  { %v1546_v33 = vpop.f32.mrb[4].mxu1 }
 0x33e   :  { %v1547_v34 = vadd.f32 %v1546_v33, %v1140_v31  ;;  %v1548_v35 = vpop.f32.mrb[5].mxu1 }
 0x33f   :  { %v1549_v36 = vadd.f32 %v1548_v35, %v1144_v32  ;;  %v1550_v37 = vpop.f32.mrb[6].mxu1 }
 0x340   :  { %v1551_v38 = vadd.f32 %v1550_v37, %v1140_v31  ;;  %v1552_v39 = vpop.f32.mrb[7].mxu1 }
 0x341   :  { %v2244_v40 = vpack.c.bf16 %v1549_v36, %v1547_v34  ;;  %v1553_v41 = vadd.f32 %v1552_v39, %v1144_v32 }
 0x342   :  { %v1557_v42 = vpack.c.bf16 %v1551_v38, %v1547_v34 }
 0x343   :  { %1580 = vst [vmem:[#allocation10 + $0x8] sm:$0xff] %v2244_v40  ;;  %v1558_v43 = vpack.c.bf16 %v1553_v41, %v1549_v36  ;;  %v2246_v44 = vpack.c.bf16 %v1553_v41, %v1551_v38 }
 0x345   :  { %1582 = vst [vmem:[#allocation10 + $0x18] sm:$0xff] %v2246_v44  ;;  %1918 = vmatprep.mubr.bf16.mxu1 %v1558_v43 }
 0x346   :  { %1919 = vmatmul.mubr.bf16.vlgmr.msra.gmra.mrb[12].mxu1 %v1557_v42 }
 0x347   :  { %2745 = shalt.err (!%p2742_p8)
}
 0x348   :  { %s2746_s29 = scalar_lea.hbm %s3021_s6, 512 }
 0x349   :  { %p2747_p9 = scmp.ne.s32.totalorder %s3021_s6, %s2746_s29  ;;  %p2750_p10 = scmp.lt.u32.totalorder %s2746_s29, %s3021_s6 }
 0x34b   :  { %p2752_p11 = pnand %p2750_p10, %p2747_p9 }
 0x34d   :  { %2755 = shalt.err (!%p2752_p11)
}
 0x34e   :  { %1973 = dma.vmem_to_hbm [thread:$0]  %s1968_s24, 512, %s3021_s6, [#allocation4], %s2817_s1, %s2817_s1, %s2818_s20  }
 0x34f   :  { %v2208_v0 = vld [vmem:[%s3020_s5 + $0x6] ss:$0 sm:$0xff]  ;;  %s2824_s14 = smov [#allocation11]   ;;  %s2825_s6 = smov [#allocation13]  }
 0x350   :  { %s1979_s4 = sshll.u32 %s2824_s14, 4  ;;  %s1991_s1 = sshll.u32 %s2825_s6, 4  ;;  %s1980_s4 = int_to_ptr.vmem [resolvable:$true] %s1979_s4  ;;  %s2978_s1 = int_to_ptr.vmem [resolvable:$true] %s1991_s1 }
 0x351   :  { %s2756_s5 = scalar_lea.vmem %s1980_s4, 256  ;;  %p2761_p13 = scmp.lt.s32.totalorder %s1980_s4, %s1980_s4 }
 0x352   :  { %p2757_p12 = scmp.ne.s32.totalorder %s1980_s4, %s2756_s5  ;;  %p2762_p0 = scmp.lt.s32.totalorder %s2756_s5, %s2756_s5 }
 0x354   :  { %p2763_p1 = por %p2762_p0, %p2761_p13 }
 0x356   :  { %p2764_p2 = pnand %p2763_p1, %p2757_p12 }
 0x3d9   :  { %v2265_v57 = vpop.f32.mrb[8].mxu1 }
 0x3da   :  { %v2266_v55 = vpop.f32.mrb[9].mxu1 }
 0x3db   :  { %v2267_v56 = vadd.f32 %v2266_v55, %v2265_v57  ;;  %v2268_v60 = vpop.f32.mrb[10].mxu1 }
 0x3dc   :  { %v2269_v62 = vpop.f32.mrb[11].mxu1 }
 0x3dd   :  { %v2270_v63 = vadd.f32 %v2269_v62, %v2268_v60  ;;  %v1880_v3 = vadd.f32 %v2267_v56, %v2208_v0 }
 0x3df   :  { %v1883_v7 = vadd.f32 %v2270_v63, %v2208_v0 }
 0x419   :  { %v2287_v1 = vpop.f32.mrb[12].mxu1 }
 0x41a   :  { %v2288_v2 = vpop.f32.mrb[13].mxu1 }
 0x41b   :  { %v2289_v4 = vadd.f32 %v2288_v2, %v2287_v1  ;;  %v2290_v5 = vpop.f32.mrb[14].mxu1 }
 0x41c   :  { %v2291_v6 = vpop.f32.mrb[15].mxu1 }
 0x41d   :  { %v1921_v8 = vadd.f32 %v2289_v4, %v1880_v3  ;;  %v2292_v9 = vadd.f32 %v2291_v6, %v2290_v5 }
 0x41f   :  { %1927 = vst [vmem:[#allocation11] sm:$0xff] %v1921_v8  ;;  %v1924_v10 = vadd.f32 %v2292_v9, %v1883_v7 }
 0x421   :  { %1928 = vst [vmem:[#allocation11 + $0x8] sm:$0xff] %v1924_v10 }
 0x422   :  { %2767 = shalt.err (!%p2764_p2)
}
 0x423   :  { %s2768_s17 = scalar_lea.hbm %s3022_s7, 256 }
 0x424   :  { %p2769_p3 = scmp.ne.s32.totalorder %s3022_s7, %s2768_s17  ;;  %p2772_p4 = scmp.lt.u32.totalorder %s2768_s17, %s3022_s7 }
 0x426   :  { %p2774_p5 = pnand %p2772_p4, %p2769_p3 }
 0x428   :  { %2777 = shalt.err (!%p2774_p5)
}
 0x429   :  { %1985 = dma.vmem_to_hbm [thread:$0]  %s1980_s4, 256, %s3022_s7, [#allocation12], %s2811_s15, %s2811_s15, %s2812_s16  }
 0x42a   :  { %s2778_s24 = scalar_lea.vmem %s2978_s1, 256  ;;  %p2783_p7 = scmp.lt.s32.totalorder %s2978_s1, %s2978_s1 }
 0x42b   :  { %p2779_p6 = scmp.ne.s32.totalorder %s2978_s1, %s2778_s24  ;;  %p2784_p8 = scmp.lt.s32.totalorder %s2778_s24, %s2778_s24 }
 0x42d   :  { %p2785_p9 = por %p2784_p8, %p2783_p7 }
 0x42f   :  { %p2786_p10 = pnand %p2785_p9, %p2779_p6 }
 0x431   :  { %2789 = shalt.err (!%p2786_p10)
}
 0x432   :  { %s2790_s27 = scalar_lea.hbm %s3023_s8, 256 }
 0x433   :  { %p2791_p11 = scmp.ne.s32.totalorder %s3023_s8, %s2790_s27  ;;  %p2794_p12 = scmp.lt.u32.totalorder %s2790_s27, %s3023_s8 }
 0x435   :  { %p2796_p13 = pnand %p2794_p12, %p2791_p11 }
 0x437   :  { %2799 = shalt.err (!%p2796_p13)
}
 0x438   :  { %1997 = dma.vmem_to_hbm [thread:$0]  %s2978_s1, 256, %s3023_s8, [#allocation12], %s2811_s15, %s2811_s15, %s2812_s16  }
 0x439   :  { %2806 = dma.done.wait [#allocation4], 512  }
 0x43a   :  { %2807 = vsyncadd [#allocation4], 4294966784 }
 0x43b   :  { %2808 = dma.done.wait [#allocation12], 512  }
 0x43c   :  { %2809 = vsyncadd [#allocation12], 4294966784 }
 0x43d   :  { %2007 = vsyncpa [#allocation3], 1 }
 0x43e   :  { %2008 = vsyncpa [#allocation6], 1 }
 0x43f   :  { %2009 = vsyncpa [#allocation9], 1 }
 0x440   :  { %2010 = vsyncpa [#allocation4], 1 }
 0x441   :  { %2011 = vsyncpa [#allocation12], 1 }

</bundles_post_ra>
